<compile_context>
chip_gen: v6e
topology: v6e:2x2x1
jax: 0.10.0
libtpu: 0.0.40
codegen_flags: <defaults>
</compile_context>

<pallas_src>
import functools

import numpy as np
import jax
import jax.numpy as jnp
from jax import lax
from jax.experimental import pallas as pl
from jax.experimental.pallas import tpu as pltpu

_BN_EPS = 1e-5
_CHUNK_LANES = 128   # contraction width per accumulated conv-matmul chunk


# ---------------------------------------------------------------------------
# Kernel
# ---------------------------------------------------------------------------
def _conv_block(act, w_ref, bgb_ref, p_ref, *, B, K, C_eff, L_conv, chunk_taps):
    """Fused Conv1d -> bias -> ReLU -> BatchNorm1d -> (AvgPool1d(2)+next pad).

    act:     (C_eff, B*L_pad)  f32 activation, columns interleaved (l-major, b-minor)
    w_ref:   (C_out, K*C_eff)  bf16 conv weight, columns ordered (k, c_in)
    bgb_ref: (C_out, 3)        f32 stacked [conv bias | bn gamma | bn beta]
    p_ref:   (B*L_conv, B*L_next) f32 constant pool(+pad) matrix
    """
    C_out = w_ref.shape[0]
    n_cols = B * L_conv

    # Conv as tap-chunked im2col matmuls accumulated in f32.  Each chunk slab
    # is (chunk_taps*C_eff, n_cols) bf16 -> small enough to live in vregs, so
    # no full im2col matrix is built and nothing spills to VMEM.
    act_bf = act.astype(jnp.bfloat16)
    acc = jnp.zeros((C_out, n_cols), jnp.float32)
    k0 = 0
    while k0 < K:                                   # static unroll (4 chunks)
        g = min(chunk_taps, K - k0)
        x_chunk = jnp.concatenate(
            [act_bf[:, (k0 + j) * B:(k0 + j) * B + n_cols] for j in range(g)],
            axis=0)
        w_chunk = w_ref[:, k0 * C_eff:(k0 + g) * C_eff]
        acc = acc + jnp.dot(w_chunk, x_chunk, preferred_element_type=jnp.float32)
        k0 += g

    bgb = bgb_ref[...]
    bias, gamma, beta = bgb[:, 0:1], bgb[:, 1:2], bgb[:, 2:3]
    y = jnp.maximum(acc + bias, 0.0)                # conv bias + ReLU (f32)

    # BatchNorm1d with batch statistics (training-mode forward): one-pass
    # moments folded into a single per-channel affine.
    inv_n = 1.0 / float(n_cols)
    s1 = jnp.sum(y, axis=1, keepdims=True)
    s2 = jnp.sum(y * y, axis=1, keepdims=True)
    mean = s1 * inv_n
    var = jnp.maximum(s2 * inv_n - mean * mean, 0.0)
    scale = gamma * lax.rsqrt(var + _BN_EPS)
    shift = beta - mean * scale
    y = y * scale + shift
    # TODO(synk): BatchNorm running_mean/running_var buffer updates (training
    # side effects) are not materialized; only the forward output is produced.

    # AvgPool1d(2) fused with zero padding for the next conv as one constant
    # matmul (kept f32: contraction is only 34-130 wide, keeps post-BN
    # activations exact).
    return jnp.dot(y, p_ref[...], preferred_element_type=jnp.float32)


def _encoder_kernel(x_ref, w1_ref, w2_ref, w3_ref, bgb1_ref, bgb2_ref,
                    bgb3_ref, p1_ref, p2_ref, p3_ref, o_ref, *, B, dims):
    act = x_ref[...]
    for w_ref, bgb_ref, p_ref, (K, C_eff, L_conv, chunk_taps) in zip(
            (w1_ref, w2_ref, w3_ref), (bgb1_ref, bgb2_ref, bgb3_ref),
            (p1_ref, p2_ref, p3_ref), dims):
        act = _conv_block(act, w_ref, bgb_ref, p_ref, B=B, K=K, C_eff=C_eff,
                          L_conv=L_conv, chunk_taps=chunk_taps)
    # act: (C_out3, B*L_out), columns batch-major (last pool matrix
    # de-interleaved the batch) -> single lane-dense 2D store.  The
    # (B, C_out*L_out) reshape/transpose is done on the host (free under jit).
    o_ref[...] = act


# ---------------------------------------------------------------------------
# Hoisted constant preprocessing (done once, outside the hot path)
# ---------------------------------------------------------------------------
def _pool_pad_matrix(B, L_conv, pad_next, batch_major_out):
    """Constant matrix fusing AvgPool1d(2) with next-layer zero padding."""
    # TODO(synk): P is dense O(B^2) and >99% zeros; replace with a
    # batch-independent (L_conv, L_out) operator before scaling batch up
    # (VMEM cliff on v7x at large B).
    L_pool = L_conv // 2
    L_out = L_pool + 2 * pad_next
    P = np.zeros((B * L_conv, B * L_out), np.float32)
    for b in range(B):
        for p_i in range(L_pool):
            if batch_major_out:
                col = b * L_out + pad_next + p_i
            else:
                col = (pad_next + p_i) * B + b
            P[(2 * p_i) * B + b, col] = 0.5
            P[(2 * p_i + 1) * B + b, col] = 0.5
    return jnp.asarray(P)


def init_params(key, channels_in):
    """Deterministic parameters for the three ConvBlocks (kernels 64/32/16)."""
    specs = [(channels_in, 16, 64, 32),    # (C_in, C_out, K, padding)
             (16, 32, 32, 16),
             (32, 64, 16, 8)]
    params = []
    for i, (cin, cout, k, pad) in enumerate(specs):
        kw, kb = jax.random.split(jax.random.fold_in(key, i))
        w = jax.random.normal(kw, (cout, cin, k), jnp.float32) / np.sqrt(cin * k)
        b = 0.01 * jax.random.normal(kb, (cout,), jnp.float32)
        params.append(dict(w=w, b=b,
                           gamma=jnp.ones((cout,), jnp.float32),
                           beta=jnp.zeros((cout,), jnp.float32),
                           padding=pad))
    return params


def prepare(params, *, batch, length):
    """One-time constant preprocessing for the fused kernel."""
    B = batch
    w_flats, bgbs, pools, dims = [], [], [], []
    c_in_pad = None
    L_in = length
    for i, p in enumerate(params):
        C_out, C_in, K = p["w"].shape
        w = p["w"]
        if i == 0:
            C_eff = -(-C_in // 8) * 8        # pad input channels to a sublane multiple
            w = jnp.pad(w, ((0, 0), (0, C_eff - C_in), (0, 0)))
            c_in_pad = C_eff
        else:
            C_eff = C_in                     # 16 / 32: already sublane-aligned
        # (C_out, C_eff, K) -> (C_out, K*C_eff): columns ordered (k, c_in),
        # matching the im2col row order built in the kernel.  bf16 MXU operand.
        w_flats.append(jnp.transpose(w, (0, 2, 1)).reshape(C_out, K * C_eff)
                       .astype(jnp.bfloat16))
        bgbs.append(jnp.stack([p["b"], p["gamma"], p["beta"]], axis=1))

        pad = p["padding"]
        L_conv = L_in + 2 * pad - K + 1
        L_pool = L_conv // 2
        last = (i + 1 == len(params))
        pad_next = 0 if last else params[i + 1]["padding"]
        pools.append(_pool_pad_matrix(B, L_conv, pad_next, batch_major_out=last))
        chunk_taps = max(1, _CHUNK_LANES // C_eff)
        dims.append((K, C_eff, L_conv, chunk_taps))
        L_in = L_pool

    return dict(B=B, pad1=params[0]["padding"], c_in_pad=c_in_pad,
                w_flats=tuple(w_flats), bgbs=tuple(bgbs), pools=tuple(pools),
                dims=tuple(dims), c_out=params[-1]["w"].shape[0], l_out=L_in)


# ---------------------------------------------------------------------------
# Forward wrapper (one fused pallas_call)
# ---------------------------------------------------------------------------
def encoder3lxs(x, prep):
    """Forward of Encoder3Lxs: x (B, L, C_in) -> (B, C_out * L_out)."""
    B, pad1, C1 = prep["B"], prep["pad1"], prep["c_in_pad"]
    _, L, C_in = x.shape
    # x.permute(0, 2, 1) + layer-1 zero padding + batch interleaving, done once
    # host-side (tiny ops, fused by XLA under jit).
    xt = jnp.transpose(x, (2, 1, 0))                        # (C_in, L, B)
    xt = jnp.pad(xt, ((0, C1 - C_in), (pad1, pad1), (0, 0)))
    act0 = xt.reshape(C1, (L + 2 * pad1) * B)

    C_out, L_out = prep["c_out"], prep["l_out"]
    args = (act0,) + prep["w_flats"] + prep["bgbs"] + prep["pools"]
    kernel = functools.partial(_encoder_kernel, B=B, dims=prep["dims"])

    # TODO(synk): at larger batch, add a leading "parallel" grid axis over
    # batch tiles (weight/pool index_maps constant so they stay VMEM-resident)
    # to shard across both v7x TensorCores and pipeline the activation DMAs.
    out2d = pl.pallas_call(
        kernel,
        out_shape=jax.ShapeDtypeStruct((C_out, B * L_out), jnp.float32),
        grid=(1,),
        in_specs=[pl.BlockSpec(a.shape, lambda i: (0, 0)) for a in args],
        out_specs=pl.BlockSpec((C_out, B * L_out), lambda i: (0, 0)),
        compiler_params=pltpu.CompilerParams(
            dimension_semantics=("arbitrary",)),
    )(*args)
    # nn.Flatten: (C_out, B*L_out) -> (B, C_out*L_out); ~4 KiB host reshape.
    return (out2d.reshape(C_out, B, L_out).transpose(1, 0, 2)
            .reshape(B, C_out * L_out))


# ---------------------------------------------------------------------------
# Pure-JAX reference (for validation only)
# ---------------------------------------------------------------------------
def _reference(x, params, eps=_BN_EPS, conv_dtype=jnp.float32):
    """PyTorch-faithful forward; conv_dtype=bfloat16 mirrors the kernel's
    bf16 conv-matmul operands (everything else stays f32)."""
    h = jnp.transpose(x, (0, 2, 1))
    for p in params:
        pad = p["padding"]
        y = lax.conv_general_dilated(
            h.astype(conv_dtype), p["w"].astype(conv_dtype),
            window_strides=(1,), padding=[(pad, pad)],
            dimension_numbers=("NCH", "OIH", "NCH"),
            preferred_element_type=jnp.float32,
            precision=lax.Precision.HIGHEST) + p["b"][None, :, None]
        y = jnp.maximum(y, 0.0)
        mean = jnp.mean(y, axis=(0, 2), keepdims=True)
        var = jnp.mean(jnp.square(y - mean), axis=(0, 2), keepdims=True)
        y = ((y - mean) * lax.rsqrt(var + eps) * p["gamma"][None, :, None]
             + p["beta"][None, :, None])
        L_pool = y.shape[-1] // 2
        h = y[:, :, :2 * L_pool].reshape(y.shape[0], y.shape[1], L_pool, 2).mean(-1)
    return h.reshape(h.shape[0], -1)


if __name__ == "__main__":
    key = jax.random.PRNGKey(0)
    k_x, k_p = jax.random.split(key)

    B, L, C_in = 2, 64, 4                  # lengths: 64 -> 32 -> 16 -> 8
    x = jax.random.normal(k_x, (B, L, C_in), jnp.float32)
    params = init_params(k_p, C_in)
    prep = prepare(params, batch=B, length=L)

    fwd = jax.jit(lambda xx: encoder3lxs(xx, prep))
    out = jax.block_until_ready(fwd(x))

    assert out.shape == (B, 64 * 8), out.shape
    assert bool(jnp.all(jnp.isfinite(out)))

    # Semantics check against a reference that rounds the conv operands to
    # bf16 exactly as the kernel does (isolates bugs from precision).
    ref_bf16 = _reference(x, params, conv_dtype=jnp.bfloat16)
    err_bf16 = float(jnp.max(jnp.abs(out - ref_bf16)))
    assert err_bf16 < 5e-3, f"mismatch vs bf16-operand reference: {err_bf16}"

    # Sanity bound on total bf16 drift vs the full-f32 reference.
    ref_f32 = _reference(x, params)
    err_f32 = float(jnp.max(jnp.abs(out - ref_f32)))
    assert err_f32 < 5e-2, f"mismatch vs f32 reference: {err_f32}"

    print("KERNEL_OK")
</pallas_src>

<mosaic_0001>
module attributes {stable_mosaic.version = 11 : i64} {
  func.func @_encoder_kernel(%arg0: i32, %arg1: memref<8x256xf32, #tpu.memory_space<vmem>>, %arg2: memref<16x512xbf16, #tpu.memory_space<vmem>>, %arg3: memref<32x512xbf16, #tpu.memory_space<vmem>>, %arg4: memref<64x512xbf16, #tpu.memory_space<vmem>>, %arg5: memref<16x3xf32, #tpu.memory_space<vmem>>, %arg6: memref<32x3xf32, #tpu.memory_space<vmem>>, %arg7: memref<64x3xf32, #tpu.memory_space<vmem>>, %arg8: memref<130x128xf32, #tpu.memory_space<vmem>>, %arg9: memref<66x64xf32, #tpu.memory_space<vmem>>, %arg10: memref<34x16xf32, #tpu.memory_space<vmem>>, %arg11: memref<64x16xf32, #tpu.memory_space<vmem>>) attributes {dimension_semantics = [#tpu.dimension_semantics<arbitrary>], iteration_bounds = array<i64: 1>, scalar_prefetch = 0 : i64, scratch_operands = 0 : i64, tpu.core_type = #tpu.core_type<tc>, window_params = [{pipeline_mode = #tpu.pipeline_mode<synchronous>, transform_indices = @transform_0, window_bounds = array<i64: 8, 256>}, {pipeline_mode = #tpu.pipeline_mode<synchronous>, transform_indices = @transform_1, window_bounds = array<i64: 16, 512>}, {pipeline_mode = #tpu.pipeline_mode<synchronous>, transform_indices = @transform_2, window_bounds = array<i64: 32, 512>}, {pipeline_mode = #tpu.pipeline_mode<synchronous>, transform_indices = @transform_3, window_bounds = array<i64: 64, 512>}, {pipeline_mode = #tpu.pipeline_mode<synchronous>, transform_indices = @transform_4, window_bounds = array<i64: 16, 3>}, {pipeline_mode = #tpu.pipeline_mode<synchronous>, transform_indices = @transform_5, window_bounds = array<i64: 32, 3>}, {pipeline_mode = #tpu.pipeline_mode<synchronous>, transform_indices = @transform_6, window_bounds = array<i64: 64, 3>}, {pipeline_mode = #tpu.pipeline_mode<synchronous>, transform_indices = @transform_7, window_bounds = array<i64: 130, 128>}, {pipeline_mode = #tpu.pipeline_mode<synchronous>, transform_indices = @transform_8, window_bounds = array<i64: 66, 64>}, {pipeline_mode = #tpu.pipeline_mode<synchronous>, transform_indices = @transform_9, window_bounds = array<i64: 34, 16>}, {pipeline_mode = #tpu.pipeline_mode<synchronous>, transform_indices = @transform_10, window_bounds = array<i64: 64, 16>}]} {
    %c0 = arith.constant 0 : index
    %c0_0 = arith.constant 0 : index
    %0 = vector.load %arg1[%c0, %c0_0] : memref<8x256xf32, #tpu.memory_space<vmem>>, vector<8x256xf32>
    %1 = arith.truncf %0 : vector<8x256xf32> to vector<8x256xbf16>
    %cst = arith.constant 0.000000e+00 : f32
    %2 = vector.broadcast %cst : f32 to vector<16x130xf32>
    %3 = vector.extract_strided_slice %1 {offsets = [0, 0], sizes = [8, 130], strides = [1, 1]} : vector<8x256xbf16> to vector<8x130xbf16>
    %4 = vector.extract_strided_slice %1 {offsets = [0, 2], sizes = [8, 130], strides = [1, 1]} : vector<8x256xbf16> to vector<8x130xbf16>
    %5 = vector.extract_strided_slice %1 {offsets = [0, 4], sizes = [8, 130], strides = [1, 1]} : vector<8x256xbf16> to vector<8x130xbf16>
    %6 = vector.extract_strided_slice %1 {offsets = [0, 6], sizes = [8, 130], strides = [1, 1]} : vector<8x256xbf16> to vector<8x130xbf16>
    %7 = vector.extract_strided_slice %1 {offsets = [0, 8], sizes = [8, 130], strides = [1, 1]} : vector<8x256xbf16> to vector<8x130xbf16>
    %8 = vector.extract_strided_slice %1 {offsets = [0, 10], sizes = [8, 130], strides = [1, 1]} : vector<8x256xbf16> to vector<8x130xbf16>
    %9 = vector.extract_strided_slice %1 {offsets = [0, 12], sizes = [8, 130], strides = [1, 1]} : vector<8x256xbf16> to vector<8x130xbf16>
    %10 = vector.extract_strided_slice %1 {offsets = [0, 14], sizes = [8, 130], strides = [1, 1]} : vector<8x256xbf16> to vector<8x130xbf16>
    %11 = vector.extract_strided_slice %1 {offsets = [0, 16], sizes = [8, 130], strides = [1, 1]} : vector<8x256xbf16> to vector<8x130xbf16>
    %12 = vector.extract_strided_slice %1 {offsets = [0, 18], sizes = [8, 130], strides = [1, 1]} : vector<8x256xbf16> to vector<8x130xbf16>
    %13 = vector.extract_strided_slice %1 {offsets = [0, 20], sizes = [8, 130], strides = [1, 1]} : vector<8x256xbf16> to vector<8x130xbf16>
    %14 = vector.extract_strided_slice %1 {offsets = [0, 22], sizes = [8, 130], strides = [1, 1]} : vector<8x256xbf16> to vector<8x130xbf16>
    %15 = vector.extract_strided_slice %1 {offsets = [0, 24], sizes = [8, 130], strides = [1, 1]} : vector<8x256xbf16> to vector<8x130xbf16>
    %16 = vector.extract_strided_slice %1 {offsets = [0, 26], sizes = [8, 130], strides = [1, 1]} : vector<8x256xbf16> to vector<8x130xbf16>
    %17 = vector.extract_strided_slice %1 {offsets = [0, 28], sizes = [8, 130], strides = [1, 1]} : vector<8x256xbf16> to vector<8x130xbf16>
    %18 = vector.extract_strided_slice %1 {offsets = [0, 30], sizes = [8, 130], strides = [1, 1]} : vector<8x256xbf16> to vector<8x130xbf16>
    %19 = tpu.concatenate %3, %4, %5, %6, %7, %8, %9, %10, %11, %12, %13, %14, %15, %16, %17, %18 in 0 : vector<8x130xbf16>, vector<8x130xbf16>, vector<8x130xbf16>, vector<8x130xbf16>, vector<8x130xbf16>, vector<8x130xbf16>, vector<8x130xbf16>, vector<8x130xbf16>, vector<8x130xbf16>, vector<8x130xbf16>, vector<8x130xbf16>, vector<8x130xbf16>, vector<8x130xbf16>, vector<8x130xbf16>, vector<8x130xbf16>, vector<8x130xbf16> -> vector<128x130xbf16>
    %c0_1 = arith.constant 0 : index
    %c0_2 = arith.constant 0 : index
    %20 = vector.load %arg2[%c0_1, %c0_2] : memref<16x512xbf16, #tpu.memory_space<vmem>>, vector<16x128xbf16>
    %cst_3 = arith.constant dense<0.000000e+00> : vector<16x130xf32>
    %21 = tpu.matmul %20, %19, %cst_3 {dimension_numbers = #tpu.dot_dimension_numbers<[1], [0], [0], [1], [0, 0, 1, 1], [], []>} : vector<16x128xbf16>, vector<128x130xbf16>, vector<16x130xf32> -> vector<16x130xf32>
    %22 = arith.addf %2, %21 : vector<16x130xf32>
    %23 = vector.extract_strided_slice %1 {offsets = [0, 32], sizes = [8, 130], strides = [1, 1]} : vector<8x256xbf16> to vector<8x130xbf16>
    %24 = vector.extract_strided_slice %1 {offsets = [0, 34], sizes = [8, 130], strides = [1, 1]} : vector<8x256xbf16> to vector<8x130xbf16>
    %25 = vector.extract_strided_slice %1 {offsets = [0, 36], sizes = [8, 130], strides = [1, 1]} : vector<8x256xbf16> to vector<8x130xbf16>
    %26 = vector.extract_strided_slice %1 {offsets = [0, 38], sizes = [8, 130], strides = [1, 1]} : vector<8x256xbf16> to vector<8x130xbf16>
    %27 = vector.extract_strided_slice %1 {offsets = [0, 40], sizes = [8, 130], strides = [1, 1]} : vector<8x256xbf16> to vector<8x130xbf16>
    %28 = vector.extract_strided_slice %1 {offsets = [0, 42], sizes = [8, 130], strides = [1, 1]} : vector<8x256xbf16> to vector<8x130xbf16>
    %29 = vector.extract_strided_slice %1 {offsets = [0, 44], sizes = [8, 130], strides = [1, 1]} : vector<8x256xbf16> to vector<8x130xbf16>
    %30 = vector.extract_strided_slice %1 {offsets = [0, 46], sizes = [8, 130], strides = [1, 1]} : vector<8x256xbf16> to vector<8x130xbf16>
    %31 = vector.extract_strided_slice %1 {offsets = [0, 48], sizes = [8, 130], strides = [1, 1]} : vector<8x256xbf16> to vector<8x130xbf16>
    %32 = vector.extract_strided_slice %1 {offsets = [0, 50], sizes = [8, 130], strides = [1, 1]} : vector<8x256xbf16> to vector<8x130xbf16>
    %33 = vector.extract_strided_slice %1 {offsets = [0, 52], sizes = [8, 130], strides = [1, 1]} : vector<8x256xbf16> to vector<8x130xbf16>
    %34 = vector.extract_strided_slice %1 {offsets = [0, 54], sizes = [8, 130], strides = [1, 1]} : vector<8x256xbf16> to vector<8x130xbf16>
    %35 = vector.extract_strided_slice %1 {offsets = [0, 56], sizes = [8, 130], strides = [1, 1]} : vector<8x256xbf16> to vector<8x130xbf16>
    %36 = vector.extract_strided_slice %1 {offsets = [0, 58], sizes = [8, 130], strides = [1, 1]} : vector<8x256xbf16> to vector<8x130xbf16>
    %37 = vector.extract_strided_slice %1 {offsets = [0, 60], sizes = [8, 130], strides = [1, 1]} : vector<8x256xbf16> to vector<8x130xbf16>
    %38 = vector.extract_strided_slice %1 {offsets = [0, 62], sizes = [8, 130], strides = [1, 1]} : vector<8x256xbf16> to vector<8x130xbf16>
    %39 = tpu.concatenate %23, %24, %25, %26, %27, %28, %29, %30, %31, %32, %33, %34, %35, %36, %37, %38 in 0 : vector<8x130xbf16>, vector<8x130xbf16>, vector<8x130xbf16>, vector<8x130xbf16>, vector<8x130xbf16>, vector<8x130xbf16>, vector<8x130xbf16>, vector<8x130xbf16>, vector<8x130xbf16>, vector<8x130xbf16>, vector<8x130xbf16>, vector<8x130xbf16>, vector<8x130xbf16>, vector<8x130xbf16>, vector<8x130xbf16>, vector<8x130xbf16> -> vector<128x130xbf16>
    %c0_4 = arith.constant 0 : index
    %c128 = arith.constant 128 : index
    %40 = vector.load %arg2[%c0_4, %c128] : memref<16x512xbf16, #tpu.memory_space<vmem>>, vector<16x128xbf16>
    %cst_5 = arith.constant dense<0.000000e+00> : vector<16x130xf32>
    %41 = tpu.matmul %40, %39, %cst_5 {dimension_numbers = #tpu.dot_dimension_numbers<[1], [0], [0], [1], [0, 0, 1, 1], [], []>} : vector<16x128xbf16>, vector<128x130xbf16>, vector<16x130xf32> -> vector<16x130xf32>
    %42 = arith.addf %22, %41 : vector<16x130xf32>
    %43 = vector.extract_strided_slice %1 {offsets = [0, 64], sizes = [8, 130], strides = [1, 1]} : vector<8x256xbf16> to vector<8x130xbf16>
    %44 = vector.extract_strided_slice %1 {offsets = [0, 66], sizes = [8, 130], strides = [1, 1]} : vector<8x256xbf16> to vector<8x130xbf16>
    %45 = vector.extract_strided_slice %1 {offsets = [0, 68], sizes = [8, 130], strides = [1, 1]} : vector<8x256xbf16> to vector<8x130xbf16>
    %46 = vector.extract_strided_slice %1 {offsets = [0, 70], sizes = [8, 130], strides = [1, 1]} : vector<8x256xbf16> to vector<8x130xbf16>
    %47 = vector.extract_strided_slice %1 {offsets = [0, 72], sizes = [8, 130], strides = [1, 1]} : vector<8x256xbf16> to vector<8x130xbf16>
    %48 = vector.extract_strided_slice %1 {offsets = [0, 74], sizes = [8, 130], strides = [1, 1]} : vector<8x256xbf16> to vector<8x130xbf16>
    %49 = vector.extract_strided_slice %1 {offsets = [0, 76], sizes = [8, 130], strides = [1, 1]} : vector<8x256xbf16> to vector<8x130xbf16>
    %50 = vector.extract_strided_slice %1 {offsets = [0, 78], sizes = [8, 130], strides = [1, 1]} : vector<8x256xbf16> to vector<8x130xbf16>
    %51 = vector.extract_strided_slice %1 {offsets = [0, 80], sizes = [8, 130], strides = [1, 1]} : vector<8x256xbf16> to vector<8x130xbf16>
    %52 = vector.extract_strided_slice %1 {offsets = [0, 82], sizes = [8, 130], strides = [1, 1]} : vector<8x256xbf16> to vector<8x130xbf16>
    %53 = vector.extract_strided_slice %1 {offsets = [0, 84], sizes = [8, 130], strides = [1, 1]} : vector<8x256xbf16> to vector<8x130xbf16>
    %54 = vector.extract_strided_slice %1 {offsets = [0, 86], sizes = [8, 130], strides = [1, 1]} : vector<8x256xbf16> to vector<8x130xbf16>
    %55 = vector.extract_strided_slice %1 {offsets = [0, 88], sizes = [8, 130], strides = [1, 1]} : vector<8x256xbf16> to vector<8x130xbf16>
    %56 = vector.extract_strided_slice %1 {offsets = [0, 90], sizes = [8, 130], strides = [1, 1]} : vector<8x256xbf16> to vector<8x130xbf16>
    %57 = vector.extract_strided_slice %1 {offsets = [0, 92], sizes = [8, 130], strides = [1, 1]} : vector<8x256xbf16> to vector<8x130xbf16>
    %58 = vector.extract_strided_slice %1 {offsets = [0, 94], sizes = [8, 130], strides = [1, 1]} : vector<8x256xbf16> to vector<8x130xbf16>
    %59 = tpu.concatenate %43, %44, %45, %46, %47, %48, %49, %50, %51, %52, %53, %54, %55, %56, %57, %58 in 0 : vector<8x130xbf16>, vector<8x130xbf16>, vector<8x130xbf16>, vector<8x130xbf16>, vector<8x130xbf16>, vector<8x130xbf16>, vector<8x130xbf16>, vector<8x130xbf16>, vector<8x130xbf16>, vector<8x130xbf16>, vector<8x130xbf16>, vector<8x130xbf16>, vector<8x130xbf16>, vector<8x130xbf16>, vector<8x130xbf16>, vector<8x130xbf16> -> vector<128x130xbf16>
    %c0_6 = arith.constant 0 : index
    %c256 = arith.constant 256 : index
    %60 = vector.load %arg2[%c0_6, %c256] : memref<16x512xbf16, #tpu.memory_space<vmem>>, vector<16x128xbf16>
    %cst_7 = arith.constant dense<0.000000e+00> : vector<16x130xf32>
    %61 = tpu.matmul %60, %59, %cst_7 {dimension_numbers = #tpu.dot_dimension_numbers<[1], [0], [0], [1], [0, 0, 1, 1], [], []>} : vector<16x128xbf16>, vector<128x130xbf16>, vector<16x130xf32> -> vector<16x130xf32>
    %62 = arith.addf %42, %61 : vector<16x130xf32>
    %63 = vector.extract_strided_slice %1 {offsets = [0, 96], sizes = [8, 130], strides = [1, 1]} : vector<8x256xbf16> to vector<8x130xbf16>
    %64 = vector.extract_strided_slice %1 {offsets = [0, 98], sizes = [8, 130], strides = [1, 1]} : vector<8x256xbf16> to vector<8x130xbf16>
    %65 = vector.extract_strided_slice %1 {offsets = [0, 100], sizes = [8, 130], strides = [1, 1]} : vector<8x256xbf16> to vector<8x130xbf16>
    %66 = vector.extract_strided_slice %1 {offsets = [0, 102], sizes = [8, 130], strides = [1, 1]} : vector<8x256xbf16> to vector<8x130xbf16>
    %67 = vector.extract_strided_slice %1 {offsets = [0, 104], sizes = [8, 130], strides = [1, 1]} : vector<8x256xbf16> to vector<8x130xbf16>
    %68 = vector.extract_strided_slice %1 {offsets = [0, 106], sizes = [8, 130], strides = [1, 1]} : vector<8x256xbf16> to vector<8x130xbf16>
    %69 = vector.extract_strided_slice %1 {offsets = [0, 108], sizes = [8, 130], strides = [1, 1]} : vector<8x256xbf16> to vector<8x130xbf16>
    %70 = vector.extract_strided_slice %1 {offsets = [0, 110], sizes = [8, 130], strides = [1, 1]} : vector<8x256xbf16> to vector<8x130xbf16>
    %71 = vector.extract_strided_slice %1 {offsets = [0, 112], sizes = [8, 130], strides = [1, 1]} : vector<8x256xbf16> to vector<8x130xbf16>
    %72 = vector.extract_strided_slice %1 {offsets = [0, 114], sizes = [8, 130], strides = [1, 1]} : vector<8x256xbf16> to vector<8x130xbf16>
    %73 = vector.extract_strided_slice %1 {offsets = [0, 116], sizes = [8, 130], strides = [1, 1]} : vector<8x256xbf16> to vector<8x130xbf16>
    %74 = vector.extract_strided_slice %1 {offsets = [0, 118], sizes = [8, 130], strides = [1, 1]} : vector<8x256xbf16> to vector<8x130xbf16>
    %75 = vector.extract_strided_slice %1 {offsets = [0, 120], sizes = [8, 130], strides = [1, 1]} : vector<8x256xbf16> to vector<8x130xbf16>
    %76 = vector.extract_strided_slice %1 {offsets = [0, 122], sizes = [8, 130], strides = [1, 1]} : vector<8x256xbf16> to vector<8x130xbf16>
    %77 = vector.extract_strided_slice %1 {offsets = [0, 124], sizes = [8, 130], strides = [1, 1]} : vector<8x256xbf16> to vector<8x130xbf16>
    %78 = vector.extract_strided_slice %1 {offsets = [0, 126], sizes = [8, 130], strides = [1, 1]} : vector<8x256xbf16> to vector<8x130xbf16>
    %79 = tpu.concatenate %63, %64, %65, %66, %67, %68, %69, %70, %71, %72, %73, %74, %75, %76, %77, %78 in 0 : vector<8x130xbf16>, vector<8x130xbf16>, vector<8x130xbf16>, vector<8x130xbf16>, vector<8x130xbf16>, vector<8x130xbf16>, vector<8x130xbf16>, vector<8x130xbf16>, vector<8x130xbf16>, vector<8x130xbf16>, vector<8x130xbf16>, vector<8x130xbf16>, vector<8x130xbf16>, vector<8x130xbf16>, vector<8x130xbf16>, vector<8x130xbf16> -> vector<128x130xbf16>
    %c0_8 = arith.constant 0 : index
    %c384 = arith.constant 384 : index
    %80 = vector.load %arg2[%c0_8, %c384] : memref<16x512xbf16, #tpu.memory_space<vmem>>, vector<16x128xbf16>
    %cst_9 = arith.constant dense<0.000000e+00> : vector<16x130xf32>
    %81 = tpu.matmul %80, %79, %cst_9 {dimension_numbers = #tpu.dot_dimension_numbers<[1], [0], [0], [1], [0, 0, 1, 1], [], []>} : vector<16x128xbf16>, vector<128x130xbf16>, vector<16x130xf32> -> vector<16x130xf32>
    %82 = arith.addf %62, %81 : vector<16x130xf32>
    %c0_10 = arith.constant 0 : index
    %c0_11 = arith.constant 0 : index
    %83 = vector.load %arg5[%c0_10, %c0_11] : memref<16x3xf32, #tpu.memory_space<vmem>>, vector<16x3xf32>
    %84 = vector.extract_strided_slice %83 {offsets = [0, 0], sizes = [16, 1], strides = [1, 1]} : vector<16x3xf32> to vector<16x1xf32>
    %85 = vector.extract_strided_slice %83 {offsets = [0, 1], sizes = [16, 1], strides = [1, 1]} : vector<16x3xf32> to vector<16x1xf32>
    %86 = vector.extract_strided_slice %83 {offsets = [0, 2], sizes = [16, 1], strides = [1, 1]} : vector<16x3xf32> to vector<16x1xf32>
    %87 = vector.broadcast %84 : vector<16x1xf32> to vector<16x130xf32>
    %88 = arith.addf %82, %87 : vector<16x130xf32>
    %cst_12 = arith.constant 0.000000e+00 : f32
    %89 = vector.broadcast %cst_12 : f32 to vector<16x130xf32>
    %90 = arith.maximumf %88, %89 : vector<16x130xf32>
    %cst_13 = arith.constant dense<0.000000e+00> : vector<16xf32>
    %91 = vector.multi_reduction <add>, %90, %cst_13 [1] : vector<16x130xf32> to vector<16xf32>
    %92 = vector.shape_cast %91 : vector<16xf32> to vector<16x1xf32>
    %93 = arith.mulf %90, %90 : vector<16x130xf32>
    %cst_14 = arith.constant dense<0.000000e+00> : vector<16xf32>
    %94 = vector.multi_reduction <add>, %93, %cst_14 [1] : vector<16x130xf32> to vector<16xf32>
    %95 = vector.shape_cast %94 : vector<16xf32> to vector<16x1xf32>
    %cst_15 = arith.constant 0.0076923077 : f32
    %96 = vector.broadcast %cst_15 : f32 to vector<16x1xf32>
    %97 = arith.mulf %92, %96 : vector<16x1xf32>
    %cst_16 = arith.constant 0.0076923077 : f32
    %98 = vector.broadcast %cst_16 : f32 to vector<16x1xf32>
    %99 = arith.mulf %95, %98 : vector<16x1xf32>
    %100 = arith.mulf %97, %97 : vector<16x1xf32>
    %101 = arith.subf %99, %100 : vector<16x1xf32>
    %cst_17 = arith.constant 0.000000e+00 : f32
    %102 = vector.broadcast %cst_17 : f32 to vector<16x1xf32>
    %103 = arith.maximumf %101, %102 : vector<16x1xf32>
    %cst_18 = arith.constant 9.99999974E-6 : f32
    %104 = vector.broadcast %cst_18 : f32 to vector<16x1xf32>
    %105 = arith.addf %103, %104 : vector<16x1xf32>
    %106 = math.rsqrt %105 : vector<16x1xf32>
    %107 = arith.mulf %85, %106 : vector<16x1xf32>
    %108 = arith.mulf %97, %107 : vector<16x1xf32>
    %109 = arith.subf %86, %108 : vector<16x1xf32>
    %110 = vector.broadcast %107 : vector<16x1xf32> to vector<16x130xf32>
    %111 = arith.mulf %90, %110 : vector<16x130xf32>
    %112 = vector.broadcast %109 : vector<16x1xf32> to vector<16x130xf32>
    %113 = arith.addf %111, %112 : vector<16x130xf32>
    %c0_19 = arith.constant 0 : index
    %c0_20 = arith.constant 0 : index
    %114 = vector.load %arg8[%c0_19, %c0_20] : memref<130x128xf32, #tpu.memory_space<vmem>>, vector<130x128xf32>
    %cst_21 = arith.constant dense<0.000000e+00> : vector<16x128xf32>
    %115 = tpu.matmul %113, %114, %cst_21 {dimension_numbers = #tpu.dot_dimension_numbers<[1], [0], [0], [1], [0, 0, 1, 1], [], []>} : vector<16x130xf32>, vector<130x128xf32>, vector<16x128xf32> -> vector<16x128xf32>
    %116 = arith.truncf %115 : vector<16x128xf32> to vector<16x128xbf16>
    %cst_22 = arith.constant 0.000000e+00 : f32
    %117 = vector.broadcast %cst_22 : f32 to vector<32x66xf32>
    %118 = vector.extract_strided_slice %116 {offsets = [0, 0], sizes = [16, 66], strides = [1, 1]} : vector<16x128xbf16> to vector<16x66xbf16>
    %119 = vector.extract_strided_slice %116 {offsets = [0, 2], sizes = [16, 66], strides = [1, 1]} : vector<16x128xbf16> to vector<16x66xbf16>
    %120 = vector.extract_strided_slice %116 {offsets = [0, 4], sizes = [16, 66], strides = [1, 1]} : vector<16x128xbf16> to vector<16x66xbf16>
    %121 = vector.extract_strided_slice %116 {offsets = [0, 6], sizes = [16, 66], strides = [1, 1]} : vector<16x128xbf16> to vector<16x66xbf16>
    %122 = vector.extract_strided_slice %116 {offsets = [0, 8], sizes = [16, 66], strides = [1, 1]} : vector<16x128xbf16> to vector<16x66xbf16>
    %123 = vector.extract_strided_slice %116 {offsets = [0, 10], sizes = [16, 66], strides = [1, 1]} : vector<16x128xbf16> to vector<16x66xbf16>
    %124 = vector.extract_strided_slice %116 {offsets = [0, 12], sizes = [16, 66], strides = [1, 1]} : vector<16x128xbf16> to vector<16x66xbf16>
    %125 = vector.extract_strided_slice %116 {offsets = [0, 14], sizes = [16, 66], strides = [1, 1]} : vector<16x128xbf16> to vector<16x66xbf16>
    %126 = tpu.concatenate %118, %119, %120, %121, %122, %123, %124, %125 in 0 : vector<16x66xbf16>, vector<16x66xbf16>, vector<16x66xbf16>, vector<16x66xbf16>, vector<16x66xbf16>, vector<16x66xbf16>, vector<16x66xbf16>, vector<16x66xbf16> -> vector<128x66xbf16>
    %c0_23 = arith.constant 0 : index
    %c0_24 = arith.constant 0 : index
    %127 = vector.load %arg3[%c0_23, %c0_24] : memref<32x512xbf16, #tpu.memory_space<vmem>>, vector<32x128xbf16>
    %cst_25 = arith.constant dense<0.000000e+00> : vector<32x66xf32>
    %128 = tpu.matmul %127, %126, %cst_25 {dimension_numbers = #tpu.dot_dimension_numbers<[1], [0], [0], [1], [0, 0, 1, 1], [], []>} : vector<32x128xbf16>, vector<128x66xbf16>, vector<32x66xf32> -> vector<32x66xf32>
    %129 = arith.addf %117, %128 : vector<32x66xf32>
    %130 = vector.extract_strided_slice %116 {offsets = [0, 16], sizes = [16, 66], strides = [1, 1]} : vector<16x128xbf16> to vector<16x66xbf16>
    %131 = vector.extract_strided_slice %116 {offsets = [0, 18], sizes = [16, 66], strides = [1, 1]} : vector<16x128xbf16> to vector<16x66xbf16>
    %132 = vector.extract_strided_slice %116 {offsets = [0, 20], sizes = [16, 66], strides = [1, 1]} : vector<16x128xbf16> to vector<16x66xbf16>
    %133 = vector.extract_strided_slice %116 {offsets = [0, 22], sizes = [16, 66], strides = [1, 1]} : vector<16x128xbf16> to vector<16x66xbf16>
    %134 = vector.extract_strided_slice %116 {offsets = [0, 24], sizes = [16, 66], strides = [1, 1]} : vector<16x128xbf16> to vector<16x66xbf16>
    %135 = vector.extract_strided_slice %116 {offsets = [0, 26], sizes = [16, 66], strides = [1, 1]} : vector<16x128xbf16> to vector<16x66xbf16>
    %136 = vector.extract_strided_slice %116 {offsets = [0, 28], sizes = [16, 66], strides = [1, 1]} : vector<16x128xbf16> to vector<16x66xbf16>
    %137 = vector.extract_strided_slice %116 {offsets = [0, 30], sizes = [16, 66], strides = [1, 1]} : vector<16x128xbf16> to vector<16x66xbf16>
    %138 = tpu.concatenate %130, %131, %132, %133, %134, %135, %136, %137 in 0 : vector<16x66xbf16>, vector<16x66xbf16>, vector<16x66xbf16>, vector<16x66xbf16>, vector<16x66xbf16>, vector<16x66xbf16>, vector<16x66xbf16>, vector<16x66xbf16> -> vector<128x66xbf16>
    %c0_26 = arith.constant 0 : index
    %c128_27 = arith.constant 128 : index
    %139 = vector.load %arg3[%c0_26, %c128_27] : memref<32x512xbf16, #tpu.memory_space<vmem>>, vector<32x128xbf16>
    %cst_28 = arith.constant dense<0.000000e+00> : vector<32x66xf32>
    %140 = tpu.matmul %139, %138, %cst_28 {dimension_numbers = #tpu.dot_dimension_numbers<[1], [0], [0], [1], [0, 0, 1, 1], [], []>} : vector<32x128xbf16>, vector<128x66xbf16>, vector<32x66xf32> -> vector<32x66xf32>
    %141 = arith.addf %129, %140 : vector<32x66xf32>
    %142 = vector.extract_strided_slice %116 {offsets = [0, 32], sizes = [16, 66], strides = [1, 1]} : vector<16x128xbf16> to vector<16x66xbf16>
    %143 = vector.extract_strided_slice %116 {offsets = [0, 34], sizes = [16, 66], strides = [1, 1]} : vector<16x128xbf16> to vector<16x66xbf16>
    %144 = vector.extract_strided_slice %116 {offsets = [0, 36], sizes = [16, 66], strides = [1, 1]} : vector<16x128xbf16> to vector<16x66xbf16>
    %145 = vector.extract_strided_slice %116 {offsets = [0, 38], sizes = [16, 66], strides = [1, 1]} : vector<16x128xbf16> to vector<16x66xbf16>
    %146 = vector.extract_strided_slice %116 {offsets = [0, 40], sizes = [16, 66], strides = [1, 1]} : vector<16x128xbf16> to vector<16x66xbf16>
    %147 = vector.extract_strided_slice %116 {offsets = [0, 42], sizes = [16, 66], strides = [1, 1]} : vector<16x128xbf16> to vector<16x66xbf16>
    %148 = vector.extract_strided_slice %116 {offsets = [0, 44], sizes = [16, 66], strides = [1, 1]} : vector<16x128xbf16> to vector<16x66xbf16>
    %149 = vector.extract_strided_slice %116 {offsets = [0, 46], sizes = [16, 66], strides = [1, 1]} : vector<16x128xbf16> to vector<16x66xbf16>
    %150 = tpu.concatenate %142, %143, %144, %145, %146, %147, %148, %149 in 0 : vector<16x66xbf16>, vector<16x66xbf16>, vector<16x66xbf16>, vector<16x66xbf16>, vector<16x66xbf16>, vector<16x66xbf16>, vector<16x66xbf16>, vector<16x66xbf16> -> vector<128x66xbf16>
    %c0_29 = arith.constant 0 : index
    %c256_30 = arith.constant 256 : index
    %151 = vector.load %arg3[%c0_29, %c256_30] : memref<32x512xbf16, #tpu.memory_space<vmem>>, vector<32x128xbf16>
    %cst_31 = arith.constant dense<0.000000e+00> : vector<32x66xf32>
    %152 = tpu.matmul %151, %150, %cst_31 {dimension_numbers = #tpu.dot_dimension_numbers<[1], [0], [0], [1], [0, 0, 1, 1], [], []>} : vector<32x128xbf16>, vector<128x66xbf16>, vector<32x66xf32> -> vector<32x66xf32>
    %153 = arith.addf %141, %152 : vector<32x66xf32>
    %154 = vector.extract_strided_slice %116 {offsets = [0, 48], sizes = [16, 66], strides = [1, 1]} : vector<16x128xbf16> to vector<16x66xbf16>
    %155 = vector.extract_strided_slice %116 {offsets = [0, 50], sizes = [16, 66], strides = [1, 1]} : vector<16x128xbf16> to vector<16x66xbf16>
    %156 = vector.extract_strided_slice %116 {offsets = [0, 52], sizes = [16, 66], strides = [1, 1]} : vector<16x128xbf16> to vector<16x66xbf16>
    %157 = vector.extract_strided_slice %116 {offsets = [0, 54], sizes = [16, 66], strides = [1, 1]} : vector<16x128xbf16> to vector<16x66xbf16>
    %158 = vector.extract_strided_slice %116 {offsets = [0, 56], sizes = [16, 66], strides = [1, 1]} : vector<16x128xbf16> to vector<16x66xbf16>
    %159 = vector.extract_strided_slice %116 {offsets = [0, 58], sizes = [16, 66], strides = [1, 1]} : vector<16x128xbf16> to vector<16x66xbf16>
    %160 = vector.extract_strided_slice %116 {offsets = [0, 60], sizes = [16, 66], strides = [1, 1]} : vector<16x128xbf16> to vector<16x66xbf16>
    %161 = vector.extract_strided_slice %116 {offsets = [0, 62], sizes = [16, 66], strides = [1, 1]} : vector<16x128xbf16> to vector<16x66xbf16>
    %162 = tpu.concatenate %154, %155, %156, %157, %158, %159, %160, %161 in 0 : vector<16x66xbf16>, vector<16x66xbf16>, vector<16x66xbf16>, vector<16x66xbf16>, vector<16x66xbf16>, vector<16x66xbf16>, vector<16x66xbf16>, vector<16x66xbf16> -> vector<128x66xbf16>
    %c0_32 = arith.constant 0 : index
    %c384_33 = arith.constant 384 : index
    %163 = vector.load %arg3[%c0_32, %c384_33] : memref<32x512xbf16, #tpu.memory_space<vmem>>, vector<32x128xbf16>
    %cst_34 = arith.constant dense<0.000000e+00> : vector<32x66xf32>
    %164 = tpu.matmul %163, %162, %cst_34 {dimension_numbers = #tpu.dot_dimension_numbers<[1], [0], [0], [1], [0, 0, 1, 1], [], []>} : vector<32x128xbf16>, vector<128x66xbf16>, vector<32x66xf32> -> vector<32x66xf32>
    %165 = arith.addf %153, %164 : vector<32x66xf32>
    %c0_35 = arith.constant 0 : index
    %c0_36 = arith.constant 0 : index
    %166 = vector.load %arg6[%c0_35, %c0_36] : memref<32x3xf32, #tpu.memory_space<vmem>>, vector<32x3xf32>
    %167 = vector.extract_strided_slice %166 {offsets = [0, 0], sizes = [32, 1], strides = [1, 1]} : vector<32x3xf32> to vector<32x1xf32>
    %168 = vector.extract_strided_slice %166 {offsets = [0, 1], sizes = [32, 1], strides = [1, 1]} : vector<32x3xf32> to vector<32x1xf32>
    %169 = vector.extract_strided_slice %166 {offsets = [0, 2], sizes = [32, 1], strides = [1, 1]} : vector<32x3xf32> to vector<32x1xf32>
    %170 = vector.broadcast %167 : vector<32x1xf32> to vector<32x66xf32>
    %171 = arith.addf %165, %170 : vector<32x66xf32>
    %cst_37 = arith.constant 0.000000e+00 : f32
    %172 = vector.broadcast %cst_37 : f32 to vector<32x66xf32>
    %173 = arith.maximumf %171, %172 : vector<32x66xf32>
    %cst_38 = arith.constant dense<0.000000e+00> : vector<32xf32>
    %174 = vector.multi_reduction <add>, %173, %cst_38 [1] : vector<32x66xf32> to vector<32xf32>
    %175 = vector.shape_cast %174 : vector<32xf32> to vector<32x1xf32>
    %176 = arith.mulf %173, %173 : vector<32x66xf32>
    %cst_39 = arith.constant dense<0.000000e+00> : vector<32xf32>
    %177 = vector.multi_reduction <add>, %176, %cst_39 [1] : vector<32x66xf32> to vector<32xf32>
    %178 = vector.shape_cast %177 : vector<32xf32> to vector<32x1xf32>
    %cst_40 = arith.constant 0.0151515156 : f32
    %179 = vector.broadcast %cst_40 : f32 to vector<32x1xf32>
    %180 = arith.mulf %175, %179 : vector<32x1xf32>
    %cst_41 = arith.constant 0.0151515156 : f32
    %181 = vector.broadcast %cst_41 : f32 to vector<32x1xf32>
    %182 = arith.mulf %178, %181 : vector<32x1xf32>
    %183 = arith.mulf %180, %180 : vector<32x1xf32>
    %184 = arith.subf %182, %183 : vector<32x1xf32>
    %cst_42 = arith.constant 0.000000e+00 : f32
    %185 = vector.broadcast %cst_42 : f32 to vector<32x1xf32>
    %186 = arith.maximumf %184, %185 : vector<32x1xf32>
    %cst_43 = arith.constant 9.99999974E-6 : f32
    %187 = vector.broadcast %cst_43 : f32 to vector<32x1xf32>
    %188 = arith.addf %186, %187 : vector<32x1xf32>
    %189 = math.rsqrt %188 : vector<32x1xf32>
    %190 = arith.mulf %168, %189 : vector<32x1xf32>
    %191 = arith.mulf %180, %190 : vector<32x1xf32>
    %192 = arith.subf %169, %191 : vector<32x1xf32>
    %193 = vector.broadcast %190 : vector<32x1xf32> to vector<32x66xf32>
    %194 = arith.mulf %173, %193 : vector<32x66xf32>
    %195 = vector.broadcast %192 : vector<32x1xf32> to vector<32x66xf32>
    %196 = arith.addf %194, %195 : vector<32x66xf32>
    %c0_44 = arith.constant 0 : index
    %c0_45 = arith.constant 0 : index
    %197 = vector.load %arg9[%c0_44, %c0_45] : memref<66x64xf32, #tpu.memory_space<vmem>>, vector<66x64xf32>
    %cst_46 = arith.constant dense<0.000000e+00> : vector<32x64xf32>
    %198 = tpu.matmul %196, %197, %cst_46 {dimension_numbers = #tpu.dot_dimension_numbers<[1], [0], [0], [1], [0, 0, 1, 1], [], []>} : vector<32x66xf32>, vector<66x64xf32>, vector<32x64xf32> -> vector<32x64xf32>
    %199 = arith.truncf %198 : vector<32x64xf32> to vector<32x64xbf16>
    %cst_47 = arith.constant 0.000000e+00 : f32
    %200 = vector.broadcast %cst_47 : f32 to vector<64x34xf32>
    %201 = vector.extract_strided_slice %199 {offsets = [0, 0], sizes = [32, 34], strides = [1, 1]} : vector<32x64xbf16> to vector<32x34xbf16>
    %202 = vector.extract_strided_slice %199 {offsets = [0, 2], sizes = [32, 34], strides = [1, 1]} : vector<32x64xbf16> to vector<32x34xbf16>
    %203 = vector.extract_strided_slice %199 {offsets = [0, 4], sizes = [32, 34], strides = [1, 1]} : vector<32x64xbf16> to vector<32x34xbf16>
    %204 = vector.extract_strided_slice %199 {offsets = [0, 6], sizes = [32, 34], strides = [1, 1]} : vector<32x64xbf16> to vector<32x34xbf16>
    %205 = tpu.concatenate %201, %202, %203, %204 in 0 : vector<32x34xbf16>, vector<32x34xbf16>, vector<32x34xbf16>, vector<32x34xbf16> -> vector<128x34xbf16>
    %c0_48 = arith.constant 0 : index
    %c0_49 = arith.constant 0 : index
    %206 = vector.load %arg4[%c0_48, %c0_49] : memref<64x512xbf16, #tpu.memory_space<vmem>>, vector<64x128xbf16>
    %cst_50 = arith.constant dense<0.000000e+00> : vector<64x34xf32>
    %207 = tpu.matmul %206, %205, %cst_50 {dimension_numbers = #tpu.dot_dimension_numbers<[1], [0], [0], [1], [0, 0, 1, 1], [], []>} : vector<64x128xbf16>, vector<128x34xbf16>, vector<64x34xf32> -> vector<64x34xf32>
    %208 = arith.addf %200, %207 : vector<64x34xf32>
    %209 = vector.extract_strided_slice %199 {offsets = [0, 8], sizes = [32, 34], strides = [1, 1]} : vector<32x64xbf16> to vector<32x34xbf16>
    %210 = vector.extract_strided_slice %199 {offsets = [0, 10], sizes = [32, 34], strides = [1, 1]} : vector<32x64xbf16> to vector<32x34xbf16>
    %211 = vector.extract_strided_slice %199 {offsets = [0, 12], sizes = [32, 34], strides = [1, 1]} : vector<32x64xbf16> to vector<32x34xbf16>
    %212 = vector.extract_strided_slice %199 {offsets = [0, 14], sizes = [32, 34], strides = [1, 1]} : vector<32x64xbf16> to vector<32x34xbf16>
    %213 = tpu.concatenate %209, %210, %211, %212 in 0 : vector<32x34xbf16>, vector<32x34xbf16>, vector<32x34xbf16>, vector<32x34xbf16> -> vector<128x34xbf16>
    %c0_51 = arith.constant 0 : index
    %c128_52 = arith.constant 128 : index
    %214 = vector.load %arg4[%c0_51, %c128_52] : memref<64x512xbf16, #tpu.memory_space<vmem>>, vector<64x128xbf16>
    %cst_53 = arith.constant dense<0.000000e+00> : vector<64x34xf32>
    %215 = tpu.matmul %214, %213, %cst_53 {dimension_numbers = #tpu.dot_dimension_numbers<[1], [0], [0], [1], [0, 0, 1, 1], [], []>} : vector<64x128xbf16>, vector<128x34xbf16>, vector<64x34xf32> -> vector<64x34xf32>
    %216 = arith.addf %208, %215 : vector<64x34xf32>
    %217 = vector.extract_strided_slice %199 {offsets = [0, 16], sizes = [32, 34], strides = [1, 1]} : vector<32x64xbf16> to vector<32x34xbf16>
    %218 = vector.extract_strided_slice %199 {offsets = [0, 18], sizes = [32, 34], strides = [1, 1]} : vector<32x64xbf16> to vector<32x34xbf16>
    %219 = vector.extract_strided_slice %199 {offsets = [0, 20], sizes = [32, 34], strides = [1, 1]} : vector<32x64xbf16> to vector<32x34xbf16>
    %220 = vector.extract_strided_slice %199 {offsets = [0, 22], sizes = [32, 34], strides = [1, 1]} : vector<32x64xbf16> to vector<32x34xbf16>
    %221 = tpu.concatenate %217, %218, %219, %220 in 0 : vector<32x34xbf16>, vector<32x34xbf16>, vector<32x34xbf16>, vector<32x34xbf16> -> vector<128x34xbf16>
    %c0_54 = arith.constant 0 : index
    %c256_55 = arith.constant 256 : index
    %222 = vector.load %arg4[%c0_54, %c256_55] : memref<64x512xbf16, #tpu.memory_space<vmem>>, vector<64x128xbf16>
    %cst_56 = arith.constant dense<0.000000e+00> : vector<64x34xf32>
    %223 = tpu.matmul %222, %221, %cst_56 {dimension_numbers = #tpu.dot_dimension_numbers<[1], [0], [0], [1], [0, 0, 1, 1], [], []>} : vector<64x128xbf16>, vector<128x34xbf16>, vector<64x34xf32> -> vector<64x34xf32>
    %224 = arith.addf %216, %223 : vector<64x34xf32>
    %225 = vector.extract_strided_slice %199 {offsets = [0, 24], sizes = [32, 34], strides = [1, 1]} : vector<32x64xbf16> to vector<32x34xbf16>
    %226 = vector.extract_strided_slice %199 {offsets = [0, 26], sizes = [32, 34], strides = [1, 1]} : vector<32x64xbf16> to vector<32x34xbf16>
    %227 = vector.extract_strided_slice %199 {offsets = [0, 28], sizes = [32, 34], strides = [1, 1]} : vector<32x64xbf16> to vector<32x34xbf16>
    %228 = vector.extract_strided_slice %199 {offsets = [0, 30], sizes = [32, 34], strides = [1, 1]} : vector<32x64xbf16> to vector<32x34xbf16>
    %229 = tpu.concatenate %225, %226, %227, %228 in 0 : vector<32x34xbf16>, vector<32x34xbf16>, vector<32x34xbf16>, vector<32x34xbf16> -> vector<128x34xbf16>
    %c0_57 = arith.constant 0 : index
    %c384_58 = arith.constant 384 : index
    %230 = vector.load %arg4[%c0_57, %c384_58] : memref<64x512xbf16, #tpu.memory_space<vmem>>, vector<64x128xbf16>
    %cst_59 = arith.constant dense<0.000000e+00> : vector<64x34xf32>
    %231 = tpu.matmul %230, %229, %cst_59 {dimension_numbers = #tpu.dot_dimension_numbers<[1], [0], [0], [1], [0, 0, 1, 1], [], []>} : vector<64x128xbf16>, vector<128x34xbf16>, vector<64x34xf32> -> vector<64x34xf32>
    %232 = arith.addf %224, %231 : vector<64x34xf32>
    %c0_60 = arith.constant 0 : index
    %c0_61 = arith.constant 0 : index
    %233 = vector.load %arg7[%c0_60, %c0_61] : memref<64x3xf32, #tpu.memory_space<vmem>>, vector<64x3xf32>
    %234 = vector.extract_strided_slice %233 {offsets = [0, 0], sizes = [64, 1], strides = [1, 1]} : vector<64x3xf32> to vector<64x1xf32>
    %235 = vector.extract_strided_slice %233 {offsets = [0, 1], sizes = [64, 1], strides = [1, 1]} : vector<64x3xf32> to vector<64x1xf32>
    %236 = vector.extract_strided_slice %233 {offsets = [0, 2], sizes = [64, 1], strides = [1, 1]} : vector<64x3xf32> to vector<64x1xf32>
    %237 = vector.broadcast %234 : vector<64x1xf32> to vector<64x34xf32>
    %238 = arith.addf %232, %237 : vector<64x34xf32>
    %cst_62 = arith.constant 0.000000e+00 : f32
    %239 = vector.broadcast %cst_62 : f32 to vector<64x34xf32>
    %240 = arith.maximumf %238, %239 : vector<64x34xf32>
    %cst_63 = arith.constant dense<0.000000e+00> : vector<64xf32>
    %241 = vector.multi_reduction <add>, %240, %cst_63 [1] : vector<64x34xf32> to vector<64xf32>
    %242 = vector.shape_cast %241 : vector<64xf32> to vector<64x1xf32>
    %243 = arith.mulf %240, %240 : vector<64x34xf32>
    %cst_64 = arith.constant dense<0.000000e+00> : vector<64xf32>
    %244 = vector.multi_reduction <add>, %243, %cst_64 [1] : vector<64x34xf32> to vector<64xf32>
    %245 = vector.shape_cast %244 : vector<64xf32> to vector<64x1xf32>
    %cst_65 = arith.constant 0.0294117648 : f32
    %246 = vector.broadcast %cst_65 : f32 to vector<64x1xf32>
    %247 = arith.mulf %242, %246 : vector<64x1xf32>
    %cst_66 = arith.constant 0.0294117648 : f32
    %248 = vector.broadcast %cst_66 : f32 to vector<64x1xf32>
    %249 = arith.mulf %245, %248 : vector<64x1xf32>
    %250 = arith.mulf %247, %247 : vector<64x1xf32>
    %251 = arith.subf %249, %250 : vector<64x1xf32>
    %cst_67 = arith.constant 0.000000e+00 : f32
    %252 = vector.broadcast %cst_67 : f32 to vector<64x1xf32>
    %253 = arith.maximumf %251, %252 : vector<64x1xf32>
    %cst_68 = arith.constant 9.99999974E-6 : f32
    %254 = vector.broadcast %cst_68 : f32 to vector<64x1xf32>
    %255 = arith.addf %253, %254 : vector<64x1xf32>
    %256 = math.rsqrt %255 : vector<64x1xf32>
    %257 = arith.mulf %235, %256 : vector<64x1xf32>
    %258 = arith.mulf %247, %257 : vector<64x1xf32>
    %259 = arith.subf %236, %258 : vector<64x1xf32>
    %260 = vector.broadcast %257 : vector<64x1xf32> to vector<64x34xf32>
    %261 = arith.mulf %240, %260 : vector<64x34xf32>
    %262 = vector.broadcast %259 : vector<64x1xf32> to vector<64x34xf32>
    %263 = arith.addf %261, %262 : vector<64x34xf32>
    %c0_69 = arith.constant 0 : index
    %c0_70 = arith.constant 0 : index
    %264 = vector.load %arg10[%c0_69, %c0_70] : memref<34x16xf32, #tpu.memory_space<vmem>>, vector<34x16xf32>
    %cst_71 = arith.constant dense<0.000000e+00> : vector<64x16xf32>
    %265 = tpu.matmul %263, %264, %cst_71 {dimension_numbers = #tpu.dot_dimension_numbers<[1], [0], [0], [1], [0, 0, 1, 1], [], []>} : vector<64x34xf32>, vector<34x16xf32>, vector<64x16xf32> -> vector<64x16xf32>
    %c0_72 = arith.constant 0 : index
    %c0_73 = arith.constant 0 : index
    %266 = vector.load %arg11[%c0_72, %c0_73] : memref<64x16xf32, #tpu.memory_space<vmem>>, vector<64x16xf32>
    tpu.vector_store %arg11[%c0_72, %c0_73], %265 {strides = array<i32>} : memref<64x16xf32, #tpu.memory_space<vmem>>, vector<64x16xf32>,
    return
  }
  func.func @transform_0(%arg0: i32) -> (i32, i32) {
    %c0_i32 = arith.constant 0 : i32
    %c0_i32_0 = arith.constant 0 : i32
    %c0_i32_1 = arith.constant 0 : i32
    return %c0_i32, %c0_i32_0 : i32, i32
  }
  func.func @transform_1(%arg0: i32) -> (i32, i32) {
    %c0_i32 = arith.constant 0 : i32
    %c0_i32_0 = arith.constant 0 : i32
    %c0_i32_1 = arith.constant 0 : i32
    return %c0_i32, %c0_i32_0 : i32, i32
  }
  func.func @transform_2(%arg0: i32) -> (i32, i32) {
    %c0_i32 = arith.constant 0 : i32
    %c0_i32_0 = arith.constant 0 : i32
    %c0_i32_1 = arith.constant 0 : i32
    return %c0_i32, %c0_i32_0 : i32, i32
  }
  func.func @transform_3(%arg0: i32) -> (i32, i32) {
    %c0_i32 = arith.constant 0 : i32
    %c0_i32_0 = arith.constant 0 : i32
    %c0_i32_1 = arith.constant 0 : i32
    return %c0_i32, %c0_i32_0 : i32, i32
  }
  func.func @transform_4(%arg0: i32) -> (i32, i32) {
    %c0_i32 = arith.constant 0 : i32
    %c0_i32_0 = arith.constant 0 : i32
    %c0_i32_1 = arith.constant 0 : i32
    return %c0_i32, %c0_i32_0 : i32, i32
  }
  func.func @transform_5(%arg0: i32) -> (i32, i32) {
    %c0_i32 = arith.constant 0 : i32
    %c0_i32_0 = arith.constant 0 : i32
    %c0_i32_1 = arith.constant 0 : i32
    return %c0_i32, %c0_i32_0 : i32, i32
  }
  func.func @transform_6(%arg0: i32) -> (i32, i32) {
    %c0_i32 = arith.constant 0 : i32
    %c0_i32_0 = arith.constant 0 : i32
    %c0_i32_1 = arith.constant 0 : i32
    return %c0_i32, %c0_i32_0 : i32, i32
  }
  func.func @transform_7(%arg0: i32) -> (i32, i32) {
    %c0_i32 = arith.constant 0 : i32
    %c0_i32_0 = arith.constant 0 : i32
    %c0_i32_1 = arith.constant 0 : i32
    return %c0_i32, %c0_i32_0 : i32, i32
  }
  func.func @transform_8(%arg0: i32) -> (i32, i32) {
    %c0_i32 = arith.constant 0 : i32
    %c0_i32_0 = arith.constant 0 : i32
    %c0_i32_1 = arith.constant 0 : i32
    return %c0_i32, %c0_i32_0 : i32, i32
  }
  func.func @transform_9(%arg0: i32) -> (i32, i32) {
    %c0_i32 = arith.constant 0 : i32
    %c0_i32_0 = arith.constant 0 : i32
    %c0_i32_1 = arith.constant 0 : i32
    return %c0_i32, %c0_i32_0 : i32, i32
  }
  func.func @transform_10(%arg0: i32) -> (i32, i32) {
    %c0_i32 = arith.constant 0 : i32
    %c0_i32_0 = arith.constant 0 : i32
    %c0_i32_1 = arith.constant 0 : i32
    return %c0_i32, %c0_i32_0 : i32, i32
  }
}

</mosaic_0001>

<bundles_post_ra>
// kernel: _lambda_.1
= control target key start
LH: loop header
LB: loop body
LE: loop exit
PB: predicated region body
PF: predicated region fallthrough
CT: control target
= control target key end

     0   :  { %s2893_s17 = smov 100   ;;  %s2894_s18 = smov 98   ;;  %vm126_vm0 = vcmask 818176   ;;  %vm132_vm1 = vcmask 801792   ;;  %vm134_vm2 = vcmask 1043456   ;;  %vm114_vm3 = vcmask 850944   ;;  %s3810_s0 = inlined_call_operand.vmem [shape: f32[8,256], index: 0, kind: input, shape index: {}]   ;;  %s3811_s1 = inlined_call_operand.vmem [shape: bf16[16,512], index: 1, kind: input, shape index: {}]   ;;  %s3812_s4 = inlined_call_operand.vmem [shape: f32[16,3], index: 4, kind: input, shape index: {}]   ;;  %s3813_s7 = inlined_call_operand.vmem [shape: f32[130,128], index: 7, kind: input, shape index: {}]   ;;  %s3814_s2 = inlined_call_operand.vmem [shape: bf16[32,512], index: 2, kind: input, shape index: {}]   ;;  %s3815_s5 = inlined_call_operand.vmem [shape: f32[32,3], index: 5, kind: input, shape index: {}]   ;;  %s3816_s8 = inlined_call_operand.vmem [shape: f32[66,64], index: 8, kind: input, shape index: {}]   ;;  %s3817_s3 = inlined_call_operand.vmem [shape: bf16[64,512], index: 3, kind: input, shape index: {}]   ;;  %s3818_s6 = inlined_call_operand.vmem [shape: f32[64,3], index: 6, kind: input, shape index: {}]   ;;  %s3819_s9 = inlined_call_operand.vmem [shape: f32[34,16], index: 9, kind: input, shape index: {}]   ;;  %s3820_s10 = inlined_call_operand.vmem [shape: f32[64,16], index: 10, kind: output, shape index: {}]  }
   0x1   :  { %v36_v0 = vld [vmem:[%s3810_s0] sm:$0xff]  ;;  %v37_v1 = vld [vmem:[%s3810_s0 + $0x8] sm:$0xff]  ;;  %s2895_s19 = smov 104   ;;  %s2896_s0 = smov 102   ;;  %vm120_vm4 = vcmask 834560   ;;  %vm102_vm5 = vcmask 883712  }
   0x2   :  { %v2978_v2 = vpack.c.bf16 %v36_v0, %v36_v0  ;;  %v2980_v3 = vpack.c.bf16 %v37_v1, %v37_v1  ;;  %s2897_s20 = smov 108   ;;  %s2898_s21 = smov 106   ;;  %vm108_vm6 = vcmask 867328   ;;  %vm90_vm7 = vcmask 916480  }
   0x3   :  { %s2899_s22 = smov 112   ;;  %s2900_s23 = smov 110   ;;  %vm96_vm8 = vcmask 900096   ;;  %vm78_vm9 = vcmask 949248   ;;  %vm84_vm10 = vcmask 932864   ;;  %vm66_vm11 = vcmask 982016  }
   0x4   :  { %122 = vrot.lane.b32.xlu0 %v2978_v2, %s2893_s17  ;;  %v42_v4 = vrot.slane %v2978_v2, 4  ;;  %v43_v5 = vrot.slane %v2980_v3, 4  ;;  %s2901_s24 = smov 116   ;;  %s2902_s25 = smov 114   ;;  %vm72_vm12 = vcmask 965632   ;;  %vm54_vm13 = vcmask 1014784  }
   0x5   :  { %s2903_s26 = smov 120   ;;  %s2904_s27 = smov 118   ;;  %vm60_vm14 = vcmask 998400   ;;  %v2909_v57 = vmov 0   ;;  %vm48_vm15 = vcmask 1031168  }
   0x6   :  { %128 = vrot.lane.b32.xlu1 %v42_v4, %s2894_s18  ;;  %s2905_s28 = smov 124   ;;  %s2906_s29 = smov 122   ;;  %314 = vmatprep.mubr.bf16.mxu0 %v2909_v57 }
   0x7   :  { %s2907_s30 = smov 126   ;;  %s2908_s11 = smov 96   ;;  %363 = vmatprep.mubr.bf16.mxu1 %v2909_v57  ;;  %2816 = vset.pattern.permute.xlu0 %v2909_v57 }
   0x8   :  { %124 = vrot.lane.b32.xlu0 %v2980_v3, %s2893_s17  ;;  %2817 = vset.pattern.permute.xlu1 %v2909_v57  ;;  %s2910_s14 = smov 64   ;;  %s2911_s15 = smov 32  }
   0xa   :  { %130 = vrot.lane.b32.xlu1 %v43_v5, %s2894_s18 }
   0xc   :  { %110 = vrot.lane.b32.xlu0 %v2978_v2, %s2895_s19 }
   0xe   :  { %112 = vrot.lane.b32.xlu1 %v2980_v3, %s2895_s19 }
  0x10   :  { %116 = vrot.lane.b32.xlu0 %v42_v4, %s2896_s0 }
  0x12   :  { %118 = vrot.lane.b32.xlu1 %v43_v5, %s2896_s0 }
  0x14   :  { %98 = vrot.lane.b32.xlu0 %v2978_v2, %s2897_s20 }
  0x16   :  { %100 = vrot.lane.b32.xlu1 %v2980_v3, %s2897_s20 }
  0x18   :  { %104 = vrot.lane.b32.xlu0 %v42_v4, %s2898_s21 }
  0x1a   :  { %106 = vrot.lane.b32.xlu1 %v43_v5, %s2898_s21 }
  0x1c   :  { %86 = vrot.lane.b32.xlu0 %v2978_v2, %s2899_s22 }
  0x1e   :  { %88 = vrot.lane.b32.xlu1 %v2980_v3, %s2899_s22 }
  0x20   :  { %92 = vrot.lane.b32.xlu0 %v42_v4, %s2900_s23 }
  0x22   :  { %94 = vrot.lane.b32.xlu1 %v43_v5, %s2900_s23 }
  0x24   :  { %74 = vrot.lane.b32.xlu0 %v2978_v2, %s2901_s24 }
  0x26   :  { %76 = vrot.lane.b32.xlu1 %v2980_v3, %s2901_s24 }
  0x28   :  { %80 = vrot.lane.b32.xlu0 %v42_v4, %s2902_s25 }
  0x2a   :  { %82 = vrot.lane.b32.xlu1 %v43_v5, %s2902_s25 }
  0x2c   :  { %62 = vrot.lane.b32.xlu0 %v2978_v2, %s2903_s26 }
  0x2e   :  { %64 = vrot.lane.b32.xlu1 %v2980_v3, %s2903_s26 }
  0x30   :  { %68 = vrot.lane.b32.xlu0 %v42_v4, %s2904_s27 }
  0x32   :  { %70 = vrot.lane.b32.xlu1 %v43_v5, %s2904_s27 }
  0x34   :  { %50 = vrot.lane.b32.xlu0 %v2978_v2, %s2905_s28 }
  0x36   :  { %52 = vrot.lane.b32.xlu1 %v2980_v3, %s2905_s28 }
  0x38   :  { %56 = vrot.lane.b32.xlu0 %v42_v4, %s2906_s29 }
  0x3a   :  { %58 = vrot.lane.b32.xlu1 %v43_v5, %s2906_s29 }
  0x3c   :  { %44 = vrot.lane.b32.xlu0 %v42_v4, %s2907_s30 }
  0x3e   :  { %46 = vrot.lane.b32.xlu1 %v43_v5, %s2907_s30 }
  0x76   :  { %v123_v6 = vpop.permute.xlu0 %122 }
  0x78   :  { %v129_v7 = vpop.permute.xlu1 %128 }
  0x7a   :  { %v125_v8 = vpop.permute.xlu0 %124 }
  0x7b   :  { %v127_v10 = vsel %vm126_vm0, %v123_v6, %v125_v8  ;;  %v2838_v6 = vld [vmem:[%s3811_s1] ss:$16 sps:$4 sm:$0xff]   ;;  %vm257_vm0 = vcmask 785408  }
  0x7c   :  { %v131_v9 = vpop.permute.xlu1 %130 }
  0x7d   :  { %v133_v11 = vsel %vm132_vm1, %v129_v7, %v131_v9  ;;  %v3017_v12 = vsel %vm134_vm2, %v125_v8, %v131_v9  ;;  %v3154_v8 = vld [vmem:[%s3812_s4 + $0x8] sm:$0xff]  ;;  %v3159_v9 = vld [vmem:[%s3812_s4] sm:$0xff]  ;;  %vm414_vm1 = vcmask 523264  }
  0x7e   :  { %255 = vrot.lane.b32.xlu1 %v3017_v12, %s2908_s11  ;;  %331 = vmatprep.subr.bf16.mxu1 %v3017_v12  ;;  %v3023_v13 = vsel %vm134_vm2, %v127_v10, %v133_v11  ;;  %v111_v14 = vpop.permute.xlu0 %110 }
  0x7f   :  { %253 = vrot.lane.b32.xlu0 %v3023_v13, %s2908_s11  ;;  %332 = vmatpush1.bf16.msra.mxu1 %v3023_v13 }
  0x80   :  { %v113_v15 = vpop.permute.xlu1 %112 }
  0x81   :  { %v115_v18 = vsel %vm114_vm3, %v111_v14, %v113_v15  ;;  %vm618_vm3 = vcmask 15360  }
  0x82   :  { %v117_v16 = vpop.permute.xlu0 %116 }
  0x84   :  { %v119_v17 = vpop.permute.xlu1 %118 }
  0x85   :  { %v121_v19 = vsel %vm120_vm4, %v117_v16, %v119_v17  ;;  %v3029_v20 = vsel %vm134_vm2, %v113_v15, %v119_v17  ;;  %vm718_vm4 = vcmask 1041408  }
  0x86   :  { %251 = vrot.lane.b32.xlu1 %v3029_v20, %s2908_s11  ;;  %333 = vmatprep.subr.bf16.mxu1 %v3029_v20  ;;  %v3035_v21 = vsel %vm134_vm2, %v115_v18, %v121_v19  ;;  %v99_v22 = vpop.permute.xlu0 %98 }
  0x87   :  { %249 = vrot.lane.b32.xlu0 %v3035_v21, %s2908_s11  ;;  %334 = vmatpush1.bf16.msra.mxu1 %v3035_v21 }
  0x88   :  { %v101_v23 = vpop.permute.xlu1 %100 }
  0x89   :  { %v103_v26 = vsel %vm102_vm5, %v99_v22, %v101_v23  ;;  %vm1192_vm5 = vcmask 539648  }
  0x8a   :  { %v105_v24 = vpop.permute.xlu0 %104 }
  0x8c   :  { %v107_v25 = vpop.permute.xlu1 %106 }
  0x8d   :  { %v109_v27 = vsel %vm108_vm6, %v105_v24, %v107_v25  ;;  %v3041_v28 = vsel %vm134_vm2, %v101_v23, %v107_v25  ;;  %vm1996_vm6 = vcmask 277504  }
  0x8e   :  { %247 = vrot.lane.b32.xlu1 %v3041_v28, %s2908_s11  ;;  %335 = vmatprep.subr.bf16.mxu1 %v3041_v28  ;;  %v3047_v29 = vsel %vm134_vm2, %v103_v26, %v109_v27  ;;  %v87_v30 = vpop.permute.xlu0 %86 }
  0x8f   :  { %245 = vrot.lane.b32.xlu0 %v3047_v29, %s2908_s11  ;;  %336 = vmatpush1.bf16.msra.mxu1 %v3047_v29 }
  0x90   :  { %v89_v31 = vpop.permute.xlu1 %88 }
  0x91   :  { %v91_v34 = vsel %vm90_vm7, %v87_v30, %v89_v31  ;;  %vm2398_vm7 = vcmask 130048  }
  0x92   :  { %v93_v32 = vpop.permute.xlu0 %92 }
  0x94   :  { %v95_v33 = vpop.permute.xlu1 %94 }
  0x95   :  { %v97_v35 = vsel %vm96_vm8, %v93_v32, %v95_v33  ;;  %v3053_v36 = vsel %vm134_vm2, %v89_v31, %v95_v33  ;;  %v2837_v31 = vld [vmem:[%s3811_s1 + $0x4] ss:$16 sps:$4 sm:$0xff]  }
  0x96   :  { %243 = vrot.lane.b32.xlu1 %v3053_v36, %s2908_s11  ;;  %337 = vmatprep.subr.bf16.mxu1 %v3053_v36  ;;  %v3059_v37 = vsel %vm134_vm2, %v91_v34, %v97_v35  ;;  %v75_v38 = vpop.permute.xlu0 %74 }
  0x97   :  { %241 = vrot.lane.b32.xlu0 %v3059_v37, %s2908_s11  ;;  %338 = vmatpush1.bf16.msra.mxu1 %v3059_v37 }
  0x98   :  { %v77_v39 = vpop.permute.xlu1 %76 }
  0x99   :  { %v79_v42 = vsel %vm78_vm9, %v75_v38, %v77_v39 }
  0x9a   :  { %v81_v40 = vpop.permute.xlu0 %80 }
  0x9c   :  { %v83_v41 = vpop.permute.xlu1 %82 }
  0x9d   :  { %v85_v43 = vsel %vm84_vm10, %v81_v40, %v83_v41  ;;  %v3065_v44 = vsel %vm134_vm2, %v77_v39, %v83_v41 }
  0x9e   :  { %239 = vrot.lane.b32.xlu1 %v3065_v44, %s2908_s11  ;;  %339 = vmatprep.subr.bf16.mxu1 %v3065_v44  ;;  %v3071_v45 = vsel %vm134_vm2, %v79_v42, %v85_v43  ;;  %v63_v46 = vpop.permute.xlu0 %62 }
  0x9f   :  { %237 = vrot.lane.b32.xlu0 %v3071_v45, %s2908_s11  ;;  %340 = vmatpush1.bf16.msra.mxu1 %v3071_v45 }
  0xa0   :  { %v65_v47 = vpop.permute.xlu1 %64 }
  0xa1   :  { %v67_v50 = vsel %vm66_vm11, %v63_v46, %v65_v47 }
  0xa2   :  { %v69_v48 = vpop.permute.xlu0 %68 }
  0xa4   :  { %v71_v49 = vpop.permute.xlu1 %70 }
  0xa5   :  { %v73_v51 = vsel %vm72_vm12, %v69_v48, %v71_v49  ;;  %v157_v52 = vsel %vm134_vm2, %v65_v47, %v71_v49 }
  0xa6   :  { %235 = vrot.lane.b32.xlu1 %v157_v52, %s2908_s11  ;;  %341 = vmatprep.subr.bf16.mxu1 %v157_v52  ;;  %v153_v53 = vsel %vm134_vm2, %v67_v50, %v73_v51  ;;  %v51_v54 = vpop.permute.xlu0 %50 }
  0xa7   :  { %233 = vrot.lane.b32.xlu0 %v153_v53, %s2908_s11  ;;  %342 = vmatpush1.bf16.msra.mxu1 %v153_v53 }
  0xa8   :  { %v53_v55 = vpop.permute.xlu1 %52 }
  0xa9   :  { %v55_v59 = vsel %vm54_vm13, %v51_v54, %v53_v55 }
  0xaa   :  { %v57_v56 = vpop.permute.xlu0 %56 }
  0xac   :  { %v59_v58 = vpop.permute.xlu1 %58 }
  0xad   :  { %v61_v60 = vsel %vm60_vm14, %v57_v56, %v59_v58  ;;  %v149_v61 = vsel %vm134_vm2, %v53_v55, %v59_v58 }
  0xae   :  { %231 = vrot.lane.b32.xlu1 %v149_v61, %s2908_s11  ;;  %343 = vmatprep.subr.bf16.mxu1 %v149_v61  ;;  %v145_v62 = vsel %vm134_vm2, %v55_v59, %v61_v60  ;;  %v45_v63 = vpop.permute.xlu0 %44 }
  0xaf   :  { %229 = vrot.lane.b32.xlu0 %v145_v62, %s2908_s11  ;;  %344 = vmatpush1.bf16.msra.mxu1 %v145_v62 }
  0xb0   :  { %v47_v0 = vpop.permute.xlu1 %46 }
  0xb1   :  { %v49_v1 = vsel %vm48_vm15, %v45_v63, %v47_v0  ;;  %v141_v4 = vsel %vm134_vm2, %v2980_v3, %v47_v0 }
  0xb2   :  { %227 = vrot.lane.b32.xlu1 %v141_v4, %s2908_s11  ;;  %345 = vmatprep.subr.bf16.mxu1 %v141_v4  ;;  %v137_v5 = vsel %vm134_vm2, %v2978_v2, %v49_v1  ;;  %vm526_vm2 = vcmask 261120  }
  0xb3   :  { %225 = vrot.lane.b32.xlu0 %v137_v5, %s2908_s11  ;;  %346 = vmatpush1.bf16.msra.mxu1 %v137_v5 }
  0xb6   :  { %412 = vrot.lane.b32.xlu1 %v3017_v12, %s2910_s14  ;;  %364 = vmatmul.mubr.bf16.vlgmr.msra.gmra.mxu1 %v2838_v6 }
  0xb7   :  { %410 = vrot.lane.b32.xlu0 %v3023_v13, %s2910_s14  ;;  %583 = vmatprep.mubr.bf16.mxu1 %v2909_v57 }
  0xba   :  { %524 = vrot.lane.b32.xlu1 %v3017_v12, %s2911_s15 }
  0xbb   :  { %522 = vrot.lane.b32.xlu0 %v3023_v13, %s2911_s15 }
  0xbe   :  { %408 = vrot.lane.b32.xlu1 %v3029_v20, %s2910_s14 }
  0xbf   :  { %406 = vrot.lane.b32.xlu0 %v3035_v21, %s2910_s14 }
  0xc2   :  { %520 = vrot.lane.b32.xlu1 %v3029_v20, %s2911_s15 }
  0xc3   :  { %518 = vrot.lane.b32.xlu0 %v3035_v21, %s2911_s15 }
  0xc6   :  { %404 = vrot.lane.b32.xlu1 %v3041_v28, %s2910_s14 }
  0xc7   :  { %402 = vrot.lane.b32.xlu0 %v3047_v29, %s2910_s14 }
  0xca   :  { %516 = vrot.lane.b32.xlu1 %v3041_v28, %s2911_s15 }
  0xcb   :  { %514 = vrot.lane.b32.xlu0 %v3047_v29, %s2911_s15 }
  0xce   :  { %400 = vrot.lane.b32.xlu1 %v3053_v36, %s2910_s14 }
  0xcf   :  { %398 = vrot.lane.b32.xlu0 %v3059_v37, %s2910_s14 }
  0xd2   :  { %512 = vrot.lane.b32.xlu1 %v3053_v36, %s2911_s15 }
  0xd3   :  { %510 = vrot.lane.b32.xlu0 %v3059_v37, %s2911_s15 }
  0xd6   :  { %396 = vrot.lane.b32.xlu1 %v3065_v44, %s2910_s14 }
  0xd7   :  { %394 = vrot.lane.b32.xlu0 %v3071_v45, %s2910_s14 }
  0xda   :  { %508 = vrot.lane.b32.xlu1 %v3065_v44, %s2911_s15 }
  0xdb   :  { %506 = vrot.lane.b32.xlu0 %v3071_v45, %s2911_s15 }
  0xde   :  { %392 = vrot.lane.b32.xlu1 %v157_v52, %s2910_s14 }
  0xdf   :  { %390 = vrot.lane.b32.xlu0 %v153_v53, %s2910_s14 }
  0xe2   :  { %504 = vrot.lane.b32.xlu1 %v157_v52, %s2911_s15 }
  0xe3   :  { %502 = vrot.lane.b32.xlu0 %v153_v53, %s2911_s15 }
  0xe6   :  { %388 = vrot.lane.b32.xlu1 %v149_v61, %s2910_s14 }
  0xe7   :  { %386 = vrot.lane.b32.xlu0 %v145_v62, %s2910_s14 }
  0xea   :  { %500 = vrot.lane.b32.xlu1 %v149_v61, %s2911_s15 }
  0xeb   :  { %498 = vrot.lane.b32.xlu0 %v145_v62, %s2911_s15 }
  0xee   :  { %384 = vrot.lane.b32.xlu1 %v141_v4, %s2910_s14 }
  0xef   :  { %382 = vrot.lane.b32.xlu0 %v137_v5, %s2910_s14 }
  0xf0   :  { %v256_v2 = vpop.permute.xlu1 %255 }
  0xf1   :  { %v254_v3 = vpop.permute.xlu0 %253  ;;  %282 = vmatprep.subr.bf16.mxu0 %v256_v2 }
  0xf2   :  { %496 = vrot.lane.b32.xlu1 %v141_v4, %s2911_s15  ;;  %v265_v7 = vsel %vm257_vm0, %v254_v3, %v256_v2 }
  0xf3   :  { %494 = vrot.lane.b32.xlu0 %v137_v5, %s2911_s15  ;;  %283 = vmatpush1.bf16.msra.mxu0 %v265_v7 }
  0xf6   :  { %607 = vperm.xlu1 %2817, %v3154_v8  }
  0xf7   :  { %602 = vperm.xlu0 %2816, %v3159_v9  }
  0xf8   :  { %v252_v10 = vpop.permute.xlu1 %251 }
  0xf9   :  { %v250_v11 = vpop.permute.xlu0 %249  ;;  %284 = vmatprep.subr.bf16.mxu0 %v252_v10 }
  0xfa   :  { %v264_v12 = vsel %vm257_vm0, %v250_v11, %v252_v10 }
  0xfb   :  { %285 = vmatpush1.bf16.msra.mxu0 %v264_v12 }
 0x100   :  { %v248_v13 = vpop.permute.xlu1 %247 }
 0x101   :  { %v246_v14 = vpop.permute.xlu0 %245  ;;  %286 = vmatprep.subr.bf16.mxu0 %v248_v13 }
 0x102   :  { %v263_v15 = vsel %vm257_vm0, %v246_v14, %v248_v13 }
 0x103   :  { %287 = vmatpush1.bf16.msra.mxu0 %v263_v15 }
 0x108   :  { %v244_v16 = vpop.permute.xlu1 %243 }
 0x109   :  { %v242_v17 = vpop.permute.xlu0 %241  ;;  %288 = vmatprep.subr.bf16.mxu0 %v244_v16 }
 0x10a   :  { %v262_v18 = vsel %vm257_vm0, %v242_v17, %v244_v16  ;;  %v2839_v16 = vld [vmem:[%s3811_s1 + $0x8] ss:$16 sps:$4 sm:$0xff]  }
 0x10b   :  { %289 = vmatpush1.bf16.msra.mxu0 %v262_v18 }
 0x110   :  { %v240_v19 = vpop.permute.xlu1 %239 }
 0x111   :  { %v238_v20 = vpop.permute.xlu0 %237  ;;  %290 = vmatprep.subr.bf16.mxu0 %v240_v19 }
 0x112   :  { %v261_v21 = vsel %vm257_vm0, %v238_v20, %v240_v19  ;;  %v2840_v20 = vld [vmem:[%s3811_s1 + $0xc] ss:$16 sps:$4 sm:$0xff]   ;;  %s2914_s1 = smov 1  }
 0x113   :  { %291 = vmatpush1.bf16.msra.mxu0 %v261_v21 }
 0x118   :  { %v236_v22 = vpop.permute.xlu1 %235 }
 0x119   :  { %v234_v23 = vpop.permute.xlu0 %233  ;;  %292 = vmatprep.subr.bf16.mxu0 %v236_v22 }
 0x11a   :  { %v260_v24 = vsel %vm257_vm0, %v234_v23, %v236_v22 }
 0x11b   :  { %293 = vmatpush1.bf16.msra.mxu0 %v260_v24 }
 0x120   :  { %v232_v25 = vpop.permute.xlu1 %231 }
 0x121   :  { %v230_v26 = vpop.permute.xlu0 %229  ;;  %294 = vmatprep.subr.bf16.mxu0 %v232_v25 }
 0x122   :  { %v259_v27 = vsel %vm257_vm0, %v230_v26, %v232_v25 }
 0x123   :  { %295 = vmatpush1.bf16.msra.mxu0 %v259_v27 }
 0x124   :  { %v228_v28 = vpop.permute.xlu1 %227 }
 0x125   :  { %v226_v29 = vpop.permute.xlu0 %225  ;;  %296 = vmatprep.subr.bf16.mxu0 %v228_v28 }
 0x126   :  { %v258_v30 = vsel %vm257_vm0, %v226_v29, %v228_v28 }
 0x127   :  { %297 = vmatpush1.bf16.msra.mxu0 %v258_v30 }
 0x128   :  { %v413_v32 = vpop.permute.xlu1 %412 }
 0x129   :  { %v411_v33 = vpop.permute.xlu0 %410  ;;  %439 = vmatprep.subr.bf16.mxu0 %v413_v32 }
 0x12a   :  { %v422_v34 = vsel %vm414_vm1, %v411_v33, %v413_v32  ;;  %315 = vmatmul.mubr.bf16.vlgmr.msra.gmra.mxu0 %v2837_v31 }
 0x12b   :  { %440 = vmatpush1.bf16.msra.mxu0 %v422_v34  ;;  %471 = vmatprep.mubr.bf16.mxu0 %v2909_v57 }
 0x12c   :  { %v525_v35 = vpop.permute.xlu1 %524 }
 0x12d   :  { %v523_v36 = vpop.permute.xlu0 %522  ;;  %551 = vmatprep.subr.bf16.mxu1 %v525_v35 }
 0x12e   :  { %v534_v37 = vsel %vm526_vm2, %v523_v36, %v525_v35 }
 0x12f   :  { %552 = vmatpush1.bf16.msra.mxu1 %v534_v37 }
 0x130   :  { %v409_v38 = vpop.permute.xlu1 %408 }
 0x131   :  { %v407_v39 = vpop.permute.xlu0 %406  ;;  %441 = vmatprep.subr.bf16.mxu0 %v409_v38 }
 0x132   :  { %v421_v40 = vsel %vm414_vm1, %v407_v39, %v409_v38 }
 0x133   :  { %442 = vmatpush1.bf16.msra.mxu0 %v421_v40 }
 0x134   :  { %v521_v41 = vpop.permute.xlu1 %520 }
 0x135   :  { %v519_v42 = vpop.permute.xlu0 %518  ;;  %553 = vmatprep.subr.bf16.mxu1 %v521_v41 }
 0x136   :  { %v533_v43 = vsel %vm526_vm2, %v519_v42, %v521_v41 }
 0x137   :  { %554 = vmatpush1.bf16.msra.mxu1 %v533_v43 }
 0x138   :  { %v405_v44 = vpop.permute.xlu1 %404 }
 0x139   :  { %v403_v45 = vpop.permute.xlu0 %402  ;;  %443 = vmatprep.subr.bf16.mxu0 %v405_v44 }
 0x13a   :  { %v420_v46 = vsel %vm414_vm1, %v403_v45, %v405_v44 }
 0x13b   :  { %444 = vmatpush1.bf16.msra.mxu0 %v420_v46 }
 0x13c   :  { %v517_v47 = vpop.permute.xlu1 %516 }
 0x13d   :  { %v515_v48 = vpop.permute.xlu0 %514  ;;  %555 = vmatprep.subr.bf16.mxu1 %v517_v47 }
 0x13e   :  { %v532_v49 = vsel %vm526_vm2, %v515_v48, %v517_v47 }
 0x13f   :  { %556 = vmatpush1.bf16.msra.mxu1 %v532_v49 }
 0x140   :  { %v401_v50 = vpop.permute.xlu1 %400 }
 0x141   :  { %v399_v51 = vpop.permute.xlu0 %398  ;;  %445 = vmatprep.subr.bf16.mxu0 %v401_v50 }
 0x142   :  { %v419_v52 = vsel %vm414_vm1, %v399_v51, %v401_v50 }
 0x143   :  { %446 = vmatpush1.bf16.msra.mxu0 %v419_v52 }
 0x144   :  { %v513_v53 = vpop.permute.xlu1 %512 }
 0x145   :  { %v511_v54 = vpop.permute.xlu0 %510  ;;  %557 = vmatprep.subr.bf16.mxu1 %v513_v53 }
 0x146   :  { %v531_v55 = vsel %vm526_vm2, %v511_v54, %v513_v53 }
 0x147   :  { %558 = vmatpush1.bf16.msra.mxu1 %v531_v55 }
 0x148   :  { %v397_v56 = vpop.permute.xlu1 %396 }
 0x149   :  { %v395_v58 = vpop.permute.xlu0 %394  ;;  %447 = vmatprep.subr.bf16.mxu0 %v397_v56 }
 0x14a   :  { %v418_v59 = vsel %vm414_vm1, %v395_v58, %v397_v56 }
 0x14b   :  { %448 = vmatpush1.bf16.msra.mxu0 %v418_v59 }
 0x14c   :  { %v509_v60 = vpop.permute.xlu1 %508 }
 0x14d   :  { %v507_v61 = vpop.permute.xlu0 %506  ;;  %559 = vmatprep.subr.bf16.mxu1 %v509_v60 }
 0x14e   :  { %v530_v62 = vsel %vm526_vm2, %v507_v61, %v509_v60 }
 0x14f   :  { %560 = vmatpush1.bf16.msra.mxu1 %v530_v62 }
 0x150   :  { %v393_v63 = vpop.permute.xlu1 %392 }
 0x151   :  { %v391_v0 = vpop.permute.xlu0 %390  ;;  %449 = vmatprep.subr.bf16.mxu0 %v393_v63 }
 0x152   :  { %v417_v1 = vsel %vm414_vm1, %v391_v0, %v393_v63 }
 0x153   :  { %450 = vmatpush1.bf16.msra.mxu0 %v417_v1 }
 0x154   :  { %v505_v4 = vpop.permute.xlu1 %504 }
 0x155   :  { %v503_v5 = vpop.permute.xlu0 %502  ;;  %561 = vmatprep.subr.bf16.mxu1 %v505_v4 }
 0x156   :  { %v529_v6 = vsel %vm526_vm2, %v503_v5, %v505_v4 }
 0x157   :  { %562 = vmatpush1.bf16.msra.mxu1 %v529_v6 }
 0x158   :  { %v389_v2 = vpop.permute.xlu1 %388 }
 0x159   :  { %v387_v3 = vpop.permute.xlu0 %386  ;;  %451 = vmatprep.subr.bf16.mxu0 %v389_v2 }
 0x15a   :  { %v416_v7 = vsel %vm414_vm1, %v387_v3, %v389_v2 }
 0x15b   :  { %452 = vmatpush1.bf16.msra.mxu0 %v416_v7 }
 0x15c   :  { %v501_v10 = vpop.permute.xlu1 %500 }
 0x15d   :  { %v499_v11 = vpop.permute.xlu0 %498  ;;  %563 = vmatprep.subr.bf16.mxu1 %v501_v10 }
 0x15e   :  { %v528_v12 = vsel %vm526_vm2, %v499_v11, %v501_v10  ;;  %v2912_v10 = vmov 1  }
 0x15f   :  { %564 = vmatpush1.bf16.msra.mxu1 %v528_v12  ;;  %2818 = vset.pattern.permute.xlu1 %v2912_v10 }
 0x160   :  { %v385_v13 = vpop.permute.xlu1 %384 }
 0x161   :  { %v383_v14 = vpop.permute.xlu0 %382  ;;  %453 = vmatprep.subr.bf16.mxu0 %v385_v13 }
 0x162   :  { %v415_v15 = vsel %vm414_vm1, %v383_v14, %v385_v13 }
 0x163   :  { %454 = vmatpush1.bf16.msra.mxu0 %v415_v15 }
 0x164   :  { %v497_v17 = vpop.permute.xlu1 %496 }
 0x165   :  { %v495_v18 = vpop.permute.xlu0 %494  ;;  %565 = vmatprep.subr.bf16.mxu1 %v497_v17 }
 0x166   :  { %v527_v19 = vsel %vm526_vm2, %v495_v18, %v497_v17  ;;  %472 = vmatmul.mubr.bf16.vlgmr.msra.gmra.mxu0 %v2839_v16 }
 0x167   :  { %566 = vmatpush1.bf16.msra.mxu1 %v527_v19 }
 0x16a   :  { %584 = vmatmul.mubr.bf16.vlgmr.msra.gmra.mxu1 %v2840_v20 }
 0x171   :  { %v608_v47 = vpop.permute.xlu1 %607 }
 0x172   :  { %v603_v34 = vpop.permute.xlu0 %602 }
 0x176   :  { %v365_v22 = vpop.f32.mrf.mxu1 }
 0x178   :  { %v367_v24 = vpop.f32.mrf.mxu1 }
 0x17a   :  { %v369_v26 = vpop.f32.mrf.mxu1 }
 0x17c   :  { %v371_v30 = vpop.f32.mrf.mxu1 }
 0x1ea   :  { %v316_v21 = vpop.f32.mrf.mxu0 }
 0x1eb   :  { %v366_v29 = vadd.f32 %v365_v22, %v316_v21 }
 0x1ec   :  { %v318_v23 = vpop.f32.mrf.mxu0 }
 0x1ed   :  { %v368_v32 = vadd.f32 %v367_v24, %v318_v23 }
 0x1ee   :  { %v320_v25 = vpop.f32.mrf.mxu0 }
 0x1ef   :  { %v370_v37 = vadd.f32 %v369_v26, %v320_v25 }
 0x1f0   :  { %v322_v27 = vpop.f32.mrf.mxu0 }
 0x1f1   :  { %v372_v42 = vadd.f32 %v371_v30, %v322_v27  ;;  %v2913_v27 = vmov 2  }
 0x1f2   :  { %2819 = vset.pattern.permute.xlu0 %v2913_v27 }
 0x226   :  { %v473_v28 = vpop.f32.mrf.mxu0 }
 0x227   :  { %v482_v33 = vadd.f32 %v473_v28, %v366_v29 }
 0x228   :  { %v475_v31 = vpop.f32.mrf.mxu0 }
 0x229   :  { %v483_v38 = vadd.f32 %v475_v31, %v368_v32 }
 0x22a   :  { %v477_v35 = vpop.f32.mrf.mxu0  ;;  %v585_v36 = vpop.f32.mrf.mxu1 }
 0x22b   :  { %v594_v39 = vadd.f32 %v585_v36, %v482_v33  ;;  %v484_v43 = vadd.f32 %v477_v35, %v370_v37  ;;  %v710_v35 = vld [vmem:[%s3813_s7 + $0x78] sm:$0xff]  ;;  %v709_v36 = vld [vmem:[%s3813_s7 + $0x70] sm:$0xff]  ;;  %v708_v37 = vld [vmem:[%s3813_s7 + $0x68] sm:$0xff] }
 0x22c   :  { %v479_v40 = vpop.f32.mrf.mxu0  ;;  %v587_v41 = vpop.f32.mrf.mxu1 }
 0x22d   :  { %v610_v44 = vadd.f32 %v603_v34, %v594_v39  ;;  %v595_v45 = vadd.f32 %v587_v41, %v483_v38  ;;  %v485_v48 = vadd.f32 %v479_v40, %v372_v42  ;;  %v707_v38 = vld [vmem:[%s3813_s7 + $0x60] sm:$0xff]  ;;  %v706_v39 = vld [vmem:[%s3813_s7 + $0x58] sm:$0xff]  ;;  %v705_v40 = vld [vmem:[%s3813_s7 + $0x50] sm:$0xff] }
 0x22e   :  { %v589_v46 = vpop.f32.mrf.mxu1  ;;  %v704_v41 = vld [vmem:[%s3813_s7 + $0x48] sm:$0xff]  ;;  %v703_v42 = vld [vmem:[%s3813_s7 + $0x40] sm:$0xff] }
 0x22f   :  { %v611_v49 = vadd.f32 %v603_v34, %v595_v45  ;;  %v596_v50 = vadd.f32 %v589_v46, %v484_v43  ;;  %v3196_v51 = vmax.f32 %v610_v44, 0.0  ;;  %v2915_v34 = vmov 0.0   ;;  %v702_v43 = vld [vmem:[%s3813_s7 + $0x38] sm:$0xff]  ;;  %v701_v44 = vld [vmem:[%s3813_s7 + $0x30] sm:$0xff]  ;;  %v700_v45 = vld [vmem:[%s3813_s7 + $0x28] sm:$0xff] }
 0x230   :  { %v591_v52 = vpop.f32.mrf.mxu1  ;;  %722 = vmatprep.subr.mxu0 %v2915_v34  ;;  %v699_v46 = vld [vmem:[%s3813_s7 + $0x20] sm:$0xff] }
 0x231   :  { %v3198_v53 = vmax.f32 %v611_v49, 0.0  ;;  %v597_v54 = vadd.f32 %v591_v52, %v485_v48  ;;  %v612_v55 = vadd.f32 %v608_v47, %v596_v50  ;;  %v627_v62 = vmul.f32 %v3196_v51, %v3196_v51  ;;  %723 = vmatpush1.msra.mxu0 %v710_v35  ;;  %v697_v48 = vld [vmem:[%s3813_s7 + $0x10] sm:$0xff]  ;;  %v696_v49 = vld [vmem:[%s3813_s7 + $0x8] sm:$0xff]  ;;  %v695_v50 = vld [vmem:[%s3813_s7] sm:$0xff] }
 0x232   :  { %724 = vmatprep.subr.mxu0 %v2915_v34  ;;  %v711_v52 = vld [vmem:[%s3813_s7 + $0x80] sm:$0x3] }
 0x233   :  { %v613_v56 = vadd.f32 %v608_v47, %v597_v54  ;;  %v619_v58 = vsel %vm618_vm3, %v3198_v53, 0.0  ;;  %v628_v59 = vmul.f32 %v3198_v53, %v3198_v53  ;;  %v3204_v60 = vmax.f32 %v612_v55, 0.0  ;;  %725 = vmatpush1.msra.mxu0 %v709_v36  ;;  %v698_v47 = vld [vmem:[%s3813_s7 + $0x18] sm:$0xff]  ;;  %s2916_s7 = smov 80  }
 0x234   :  { %v620_v61 = vadd.f32 %v619_v58, %v3196_v51  ;;  %726 = vmatprep.subr.mxu0 %v2915_v34 }
 0x235   :  { %v3209_v63 = vmax.f32 %v613_v56, 0.0  ;;  %v631_v0 = vsel %vm618_vm3, %v628_v59, 0.0  ;;  %v629_v6 = vmul.f32 %v3204_v60, %v3204_v60  ;;  %727 = vmatpush1.msra.mxu0 %v708_v37  ;;  %v2842_v37 = vld [vmem:[%s3814_s2 + $0x24] ss:$16 sps:$4 sm:$0xff]  }
 0x236   :  { %621 = vadd.xlane.f32.xlu1 %v620_v61  ;;  %v632_v1 = vadd.f32 %v631_v0, %v627_v62  ;;  %728 = vmatprep.subr.mxu0 %v2915_v34 }
 0x237   :  { %v630_v4 = vmul.f32 %v3209_v63, %v3209_v63  ;;  %v623_v5 = vsel %vm618_vm3, %v3209_v63, 0.0  ;;  %729 = vmatpush1.msra.mxu0 %v707_v38  ;;  %v2843_v38 = vld [vmem:[%s3814_s2] ss:$16 sps:$4 sm:$0xff]  }
 0x238   :  { %633 = vadd.xlane.f32.xlu0 %v632_v1  ;;  %v624_v7 = vadd.f32 %v623_v5, %v3204_v60  ;;  %730 = vmatprep.subr.mxu0 %v2915_v34 }
 0x239   :  { %v635_v2 = vsel %vm618_vm3, %v630_v4, 0.0  ;;  %731 = vmatpush1.msra.mxu0 %v706_v39 }
 0x23a   :  { %v636_v3 = vadd.f32 %v635_v2, %v629_v6  ;;  %732 = vmatprep.subr.mxu0 %v2915_v34 }
 0x23b   :  { %733 = vmatpush1.msra.mxu0 %v705_v40 }
 0x23c   :  { %637 = vadd.xlane.f32.xlu1 %v636_v3  ;;  %625 = vadd.xlane.f32.xlu0 %v624_v7 }
 0x23d   :  { %734 = vmatprep.subr.mxu0 %v2915_v34 }
 0x23e   :  { %735 = vmatpush1.msra.mxu0 %v704_v41 }
 0x23f   :  { %736 = vmatprep.subr.mxu0 %v2915_v34 }
 0x240   :  { %737 = vmatpush1.msra.mxu0 %v703_v42 }
 0x241   :  { %738 = vmatprep.subr.mxu0 %v2915_v34 }
 0x242   :  { %739 = vmatpush1.msra.mxu0 %v702_v43  ;;  %v2846_v43 = vld [vmem:[%s3814_s2 + $0x28] ss:$16 sps:$4 sm:$0xff]  }
 0x243   :  { %740 = vmatprep.subr.mxu0 %v2915_v34 }
 0x244   :  { %741 = vmatpush1.msra.mxu0 %v701_v44 }
 0x245   :  { %742 = vmatprep.subr.mxu0 %v2915_v34 }
 0x246   :  { %743 = vmatpush1.msra.mxu0 %v700_v45 }
 0x247   :  { %744 = vmatprep.subr.mxu0 %v2915_v34 }
 0x248   :  { %745 = vmatpush1.msra.mxu0 %v699_v46 }
 0x249   :  { %746 = vmatprep.subr.mxu0 %v2915_v34 }
 0x24a   :  { %747 = vmatpush1.msra.mxu0 %v698_v47  ;;  %v2844_v47 = vld [vmem:[%s3814_s2 + $0x20] ss:$16 sps:$4 sm:$0xff]  }
 0x24b   :  { %748 = vmatprep.subr.mxu0 %v2915_v34 }
 0x24c   :  { %749 = vmatpush1.msra.mxu0 %v697_v48  ;;  %v2847_v48 = vld [vmem:[%s3814_s2 + $0xc] ss:$16 sps:$4 sm:$0xff]  }
 0x24d   :  { %750 = vmatprep.subr.mxu0 %v2915_v34 }
 0x24e   :  { %751 = vmatpush1.msra.mxu0 %v696_v49 }
 0x24f   :  { %752 = vmatprep.subr.mxu0 %v2915_v34 }
 0x250   :  { %753 = vmatpush1.msra.mxu0 %v695_v50 }
 0x251   :  { %784 = vmatprep.subr.mxu0 %v2915_v34 }
 0x252   :  { %2415 = vmatpush2.msk.msra.mxu0 %vm718_vm4, %v711_v52 }
 0x2bf   :  { %v622_v11 = vpop.xlane.xlu1 %621 }
 0x2c0   :  { %v639_v12 = vmul.f32 0.0076923077, %v622_v11 }
 0x2c1   :  { %v634_v13 = vpop.xlane.xlu0 %633 }
 0x2c2   :  { %v643_v14 = vmul.f32 %v639_v12, %v639_v12  ;;  %v641_v15 = vmul.f32 0.0076923077, %v634_v13 }
 0x2c4   :  { %v645_v16 = vsub.f32 %v641_v15, %v643_v14 }
 0x2c5   :  { %v626_v17 = vpop.xlane.xlu0 %625  ;;  %v638_v18 = vpop.xlane.xlu1 %637 }
 0x2c6   :  { %v647_v19 = vmax.f32 %v645_v16, 0.0  ;;  %v640_v20 = vmul.f32 0.0076923077, %v626_v17  ;;  %v642_v23 = vmul.f32 0.0076923077, %v638_v18 }
 0x2c7   :  { %v2841_v18 = vld [vmem:[%s3814_s2 + $0x4] ss:$16 sps:$4 sm:$0xff]  }
 0x2c8   :  { %v649_v21 = vadd.f32 1e-05, %v647_v19  ;;  %v644_v22 = vmul.f32 %v640_v20, %v640_v20  ;;  %2586 = vmatprep.mubr.bf16.mxu1 %v2841_v18  ;;  %v2845_v19 = vld [vmem:[%s3814_s2 + $0x8] ss:$16 sps:$4 sm:$0xff]  }
 0x2ca   :  { %2865 = vrsqrt.f32 %v649_v21  ;;  %v646_v24 = vsub.f32 %v642_v23, %v644_v22  ;;  %v3374_v21 = vld [vmem:[%s3815_s5 + $0x8] sm:$0xff]  ;;  %v3379_v22 = vld [vmem:[%s3815_s5 + $0x10] sm:$0xff]  ;;  %v3386_v23 = vld [vmem:[%s3815_s5 + $0x18] sm:$0xff] }
 0x2cc   :  { %v648_v25 = vmax.f32 %v646_v24, 0.0 }
 0x2ce   :  { %v650_v26 = vadd.f32 1e-05, %v648_v25 }
 0x2d0   :  { %2867 = vrsqrt.f32 %v650_v26 }
 0x2d7   :  { %v2866_v28 = vpop.eup %2865 }
 0x2d8   :  { %v653_v29 = vmul.f32 %v2866_v28, %v3159_v9 }
 0x2da   :  { %v655_v30 = vmul.f32 %v653_v29, %v639_v12 }
 0x2dc   :  { %659 = vrot.lane.b32.xlu0 %v655_v30, %s2914_s1 }
 0x2dd   :  { %v2868_v31 = vpop.eup %2867 }
 0x2de   :  { %v654_v32 = vmul.f32 %v2868_v31, %v3154_v8 }
 0x2e0   :  { %v656_v33 = vmul.f32 %v654_v32, %v640_v20  ;;  %v3368_v20 = vld [vmem:[%s3815_s5] sm:$0xff] }
 0x2e2   :  { %661 = vrot.lane.b32.xlu1 %v656_v33, %s2914_s1 }
 0x2e6   :  { %669 = vperm.xlu1 %2818, %v653_v29  }
 0x2ea   :  { %674 = vperm.xlu1 %2818, %v654_v32  }
 0x2ee   :  { %2820 = vset.pattern.permute.xlu1 %v2913_v27 }
 0x34e   :  { %v660_v54 = vpop.permute.xlu0 %659 }
 0x34f   :  { %v665_v55 = vsub.f32 %v3159_v9, %v660_v54 }
 0x351   :  { %683 = vperm.xlu0 %2819, %v665_v55  }
 0x354   :  { %v662_v56 = vpop.permute.xlu1 %661 }
 0x355   :  { %v666_v58 = vsub.f32 %v3154_v8, %v662_v56  ;;  %2822 = vset.pattern.permute.xlu0 %v2909_v57  ;;  %v2848_v56 = vld [vmem:[%s3814_s2 + $0x2c] ss:$16 sps:$4 sm:$0xff]  }
 0x357   :  { %688 = vperm.xlu1 %2820, %v666_v58  }
 0x35b   :  { %2821 = vset.pattern.permute.xlu1 %v2909_v57 }
 0x361   :  { %v670_v59 = vpop.permute.xlu1 %669 }
 0x362   :  { %v677_v61 = vmul.f32 %v670_v59, %v3196_v51  ;;  %v678_v62 = vmul.f32 %v670_v59, %v3198_v53 }
 0x365   :  { %v675_v9 = vpop.permute.xlu1 %674 }
 0x366   :  { %v679_v5 = vmul.f32 %v675_v9, %v3204_v60  ;;  %v680_v8 = vmul.f32 %v675_v9, %v3209_v63 }
 0x3cc   :  { %v684_v0 = vpop.permute.xlu0 %683 }
 0x3cd   :  { %v691_v1 = vadd.f32 %v684_v0, %v677_v61  ;;  %v692_v4 = vadd.f32 %v684_v0, %v678_v62 }
 0x3cf   :  { %2416 = vmatprep.mubr.msk.f32.mxu0 %vm618_vm3, %v692_v4 }
 0x3d0   :  { %787 = vmatmul.mubr.f32.vlgmr.msra.gmra.mxu0 %v691_v1 }
 0x3d2   :  { %v689_v6 = vpop.permute.xlu1 %688 }
 0x3d3   :  { %v693_v2 = vadd.f32 %v689_v6, %v679_v5  ;;  %v694_v3 = vadd.f32 %v689_v6, %v680_v8 }
 0x3d5   :  { %2417 = vmatprep.mubr.msk.f32.mxu0 %vm618_vm3, %v694_v3 }
 0x3d6   :  { %792 = vmatmul.mubr.f32.gmra.mxu0 %v693_v2 }
 0x3d7   :  { %2626 = vmatprep.mubr.bf16.mxu0 %v2845_v19 }
 0x490   :  { %v788_v51 = vpop.f32.mrf.mxu0 }
 0x492   :  { %v790_v7 = vpop.f32.mrf.mxu0 }
 0x496   :  { %v793_v53 = vpop.f32.mrf.mxu0 }
 0x497   :  { %v3289_v11 = vpack.c.bf16 %v793_v53, %v788_v51 }
 0x498   :  { %v795_v12 = vpop.f32.mrf.mxu0 }
 0x499   :  { %814 = vrot.lane.b32.xlu1 %v3289_v11, %s2901_s24  ;;  %817 = vrot.lane.b32.xlu0 %v3289_v11, %s2902_s25 }
 0x49d   :  { %808 = vrot.lane.b32.xlu1 %v3289_v11, %s2903_s26  ;;  %811 = vrot.lane.b32.xlu0 %v3289_v11, %s2904_s27 }
 0x4a1   :  { %802 = vrot.lane.b32.xlu1 %v3289_v11, %s2905_s28  ;;  %805 = vrot.lane.b32.xlu0 %v3289_v11, %s2906_s29 }
 0x4a5   :  { %799 = vrot.lane.b32.xlu0 %v3289_v11, %s2907_s30 }
 0x50b   :  { %v3305_v60 = vpop.permute.xlu1 %814  ;;  %v3307_v63 = vpop.permute.xlu0 %817 }
 0x50c   :  { %852 = vrot.lane.b32.xlu0 %v3305_v60, %s2899_s22  ;;  %854 = vrot.lane.b32.xlu1 %v3307_v63, %s2899_s22 }
 0x50f   :  { %v3313_v13 = vpop.permute.xlu1 %808  ;;  %v3315_v14 = vpop.permute.xlu0 %811 }
 0x510   :  { %848 = vrot.lane.b32.xlu0 %v3313_v13, %s2899_s22  ;;  %850 = vrot.lane.b32.xlu1 %v3315_v14, %s2899_s22 }
 0x513   :  { %v3321_v15 = vpop.permute.xlu1 %802  ;;  %v3323_v16 = vpop.permute.xlu0 %805 }
 0x514   :  { %844 = vrot.lane.b32.xlu0 %v3321_v15, %s2899_s22  ;;  %846 = vrot.lane.b32.xlu1 %v3323_v16, %s2899_s22 }
 0x517   :  { %v3329_v17 = vpop.permute.xlu0 %799 }
 0x518   :  { %840 = vrot.lane.b32.xlu0 %v3289_v11, %s2899_s22  ;;  %842 = vrot.lane.b32.xlu1 %v3329_v17, %s2899_s22 }
 0x51c   :  { %1097 = vrot.lane.b32.xlu0 %v3307_v63, %s2916_s7  ;;  %1004 = vrot.lane.b32.xlu1 %v3307_v63, %s2908_s11 }
 0x520   :  { %1095 = vrot.lane.b32.xlu0 %v3305_v60, %s2916_s7  ;;  %1002 = vrot.lane.b32.xlu1 %v3305_v60, %s2908_s11 }
 0x524   :  { %1093 = vrot.lane.b32.xlu0 %v3315_v14, %s2916_s7  ;;  %1000 = vrot.lane.b32.xlu1 %v3315_v14, %s2908_s11 }
 0x528   :  { %1091 = vrot.lane.b32.xlu0 %v3313_v13, %s2916_s7  ;;  %998 = vrot.lane.b32.xlu1 %v3313_v13, %s2908_s11 }
 0x52c   :  { %1089 = vrot.lane.b32.xlu0 %v3323_v16, %s2916_s7  ;;  %996 = vrot.lane.b32.xlu1 %v3323_v16, %s2908_s11 }
 0x530   :  { %1087 = vrot.lane.b32.xlu0 %v3321_v15, %s2916_s7  ;;  %994 = vrot.lane.b32.xlu1 %v3321_v15, %s2908_s11 }
 0x534   :  { %1085 = vrot.lane.b32.xlu0 %v3329_v17, %s2916_s7  ;;  %992 = vrot.lane.b32.xlu1 %v3329_v17, %s2908_s11 }
 0x538   :  { %1083 = vrot.lane.b32.xlu0 %v3289_v11, %s2916_s7  ;;  %990 = vrot.lane.b32.xlu1 %v3289_v11, %s2908_s11 }
 0x53c   :  { %1166 = vperm.xlu1 %2821, %v3368_v20   ;;  %1171 = vperm.xlu0 %2822, %v3374_v21  }
 0x540   :  { %1176 = vperm.xlu1 %2821, %v3379_v22   ;;  %2823 = vset.pattern.permute.xlu0 %v2912_v10 }
 0x544   :  { %1181 = vperm.xlu1 %2821, %v3386_v23  }
 0x548   :  { %2824 = vset.pattern.permute.xlu1 %v2912_v10 }
 0x57e   :  { %v855_v24 = vpop.permute.xlu1 %854  ;;  %v853_v25 = vpop.permute.xlu0 %852 }
 0x57f   :  { %2570 = vmatprep.subr.bf16.mxu1 %v855_v24 }
 0x580   :  { %2571 = vmatpush3.bf16.msra.mxu1 %v855_v24 }
 0x581   :  { %2572 = vmatprep.subr.bf16.mxu1 %v853_v25 }
 0x582   :  { %v851_v26 = vpop.permute.xlu1 %850  ;;  %v849_v29 = vpop.permute.xlu0 %848 }
 0x584   :  { %2573 = vmatpush3.bf16.msra.mxu1 %v853_v25 }
 0x585   :  { %2574 = vmatprep.subr.bf16.mxu1 %v851_v26 }
 0x586   :  { %v847_v28 = vpop.permute.xlu1 %846  ;;  %v845_v32 = vpop.permute.xlu0 %844 }
 0x588   :  { %2575 = vmatpush3.bf16.msra.mxu1 %v851_v26 }
 0x589   :  { %2576 = vmatprep.subr.bf16.mxu1 %v849_v29 }
 0x58a   :  { %v843_v30 = vpop.permute.xlu1 %842  ;;  %v841_v35 = vpop.permute.xlu0 %840 }
 0x58c   :  { %2577 = vmatpush3.bf16.msra.mxu1 %v849_v29 }
 0x58d   :  { %2578 = vmatprep.subr.bf16.mxu1 %v847_v28 }
 0x58e   :  { %v1005_v31 = vpop.permute.xlu1 %1004  ;;  %v1098_v44 = vpop.permute.xlu0 %1097 }
 0x58f   :  { %2610 = vmatprep.subr.bf16.mxu0 %v1005_v31 }
 0x590   :  { %2579 = vmatpush3.bf16.msra.mxu1 %v847_v28  ;;  %2611 = vmatpush3.bf16.msra.mxu0 %v1005_v31 }
 0x591   :  { %2580 = vmatprep.subr.bf16.mxu1 %v845_v32 }
 0x592   :  { %v1003_v33 = vpop.permute.xlu1 %1002  ;;  %v1096_v45 = vpop.permute.xlu0 %1095 }
 0x593   :  { %2612 = vmatprep.subr.bf16.mxu0 %v1003_v33 }
 0x594   :  { %2581 = vmatpush3.bf16.msra.mxu1 %v845_v32  ;;  %2613 = vmatpush3.bf16.msra.mxu0 %v1003_v33 }
 0x595   :  { %2582 = vmatprep.subr.bf16.mxu1 %v843_v30 }
 0x596   :  { %v1001_v34 = vpop.permute.xlu1 %1000  ;;  %v1094_v46 = vpop.permute.xlu0 %1093 }
 0x597   :  { %2614 = vmatprep.subr.bf16.mxu0 %v1001_v34 }
 0x598   :  { %2583 = vmatpush3.bf16.msra.mxu1 %v843_v30  ;;  %2615 = vmatpush3.bf16.msra.mxu0 %v1001_v34 }
 0x599   :  { %2584 = vmatprep.subr.bf16.mxu1 %v841_v35 }
 0x59a   :  { %v999_v36 = vpop.permute.xlu1 %998  ;;  %v1092_v49 = vpop.permute.xlu0 %1091 }
 0x59b   :  { %2616 = vmatprep.subr.bf16.mxu0 %v999_v36 }
 0x59c   :  { %2585 = vmatpush3.bf16.msra.mxu1 %v841_v35  ;;  %2617 = vmatpush3.bf16.msra.mxu0 %v999_v36 }
 0x59d   :  { %2590 = vmatprep.subr.bf16.mxu1 %v3307_v63 }
 0x59e   :  { %v997_v39 = vpop.permute.xlu1 %996  ;;  %v1090_v50 = vpop.permute.xlu0 %1089 }
 0x59f   :  { %2587 = vmatmul.mubr.bf16.vlgmr.msra.gmra.mxu1 %v2842_v37  ;;  %2618 = vmatprep.subr.bf16.mxu0 %v997_v39 }
 0x5a0   :  { %2591 = vmatpush3.bf16.msra.mxu1 %v3307_v63  ;;  %2619 = vmatpush3.bf16.msra.mxu0 %v997_v39 }
 0x5a1   :  { %2592 = vmatprep.subr.bf16.mxu1 %v3305_v60  ;;  %2606 = vmatprep.mubr.bf16.mxu1 %v2843_v38 }
 0x5a2   :  { %v995_v40 = vpop.permute.xlu1 %994  ;;  %v1088_v52 = vpop.permute.xlu0 %1087 }
 0x5a3   :  { %2620 = vmatprep.subr.bf16.mxu0 %v995_v40 }
 0x5a4   :  { %2593 = vmatpush3.bf16.msra.mxu1 %v3305_v60  ;;  %2621 = vmatpush3.bf16.msra.mxu0 %v995_v40 }
 0x5a5   :  { %2594 = vmatprep.subr.bf16.mxu1 %v3315_v14 }
 0x5a6   :  { %v993_v41 = vpop.permute.xlu1 %992  ;;  %v1086_v54 = vpop.permute.xlu0 %1085 }
 0x5a7   :  { %2622 = vmatprep.subr.bf16.mxu0 %v993_v41 }
 0x5a8   :  { %2595 = vmatpush3.bf16.msra.mxu1 %v3315_v14  ;;  %2623 = vmatpush3.bf16.msra.mxu0 %v993_v41 }
 0x5a9   :  { %2596 = vmatprep.subr.bf16.mxu1 %v3313_v13 }
 0x5aa   :  { %v991_v42 = vpop.permute.xlu1 %990  ;;  %v1084_v55 = vpop.permute.xlu0 %1083 }
 0x5ab   :  { %2624 = vmatprep.subr.bf16.mxu0 %v991_v42 }
 0x5ac   :  { %2597 = vmatpush3.bf16.msra.mxu1 %v3313_v13  ;;  %2625 = vmatpush3.bf16.msra.mxu0 %v991_v42 }
 0x5ad   :  { %2598 = vmatprep.subr.bf16.mxu1 %v3323_v16 }
 0x5af   :  { %2627 = vmatmul.mubr.bf16.vlgmr.msra.gmra.mxu0 %v2846_v43 }
 0x5b0   :  { %2599 = vmatpush3.bf16.msra.mxu1 %v3323_v16 }
 0x5b1   :  { %2600 = vmatprep.subr.bf16.mxu1 %v3321_v15 }
 0x5b4   :  { %2601 = vmatpush3.bf16.msra.mxu1 %v3321_v15 }
 0x5b5   :  { %2602 = vmatprep.subr.bf16.mxu1 %v3329_v17 }
 0x5b7   :  { %v1167_v8 = vpop.permute.xlu1 %1166  ;;  %v1172_v28 = vpop.permute.xlu0 %1171 }
 0x5b8   :  { %2603 = vmatpush3.bf16.msra.mxu1 %v3329_v17 }
 0x5b9   :  { %2604 = vmatprep.subr.bf16.mxu1 %v3289_v11 }
 0x5bb   :  { %v1177_v60 = vpop.permute.xlu1 %1176 }
 0x5bc   :  { %2605 = vmatpush3.bf16.msra.mxu1 %v3289_v11 }
 0x5bd   :  { %2630 = vmatprep.subr.bf16.mxu1 %v1098_v44 }
 0x5bf   :  { %2607 = vmatmul.mubr.bf16.vlgmr.msra.gmra.mxu1 %v2844_v47  ;;  %v1182_v32 = vpop.permute.xlu1 %1181 }
 0x5c0   :  { %2631 = vmatpush3.bf16.msra.mxu1 %v1098_v44  ;;  %2646 = vmatprep.mubr.bf16.mxu1 %v2847_v48 }
 0x5c1   :  { %2632 = vmatprep.subr.bf16.mxu1 %v1096_v45 }
 0x5c4   :  { %2633 = vmatpush3.bf16.msra.mxu1 %v1096_v45 }
 0x5c5   :  { %2634 = vmatprep.subr.bf16.mxu1 %v1094_v46 }
 0x5c8   :  { %2635 = vmatpush3.bf16.msra.mxu1 %v1094_v46 }
 0x5c9   :  { %2636 = vmatprep.subr.bf16.mxu1 %v1092_v49 }
 0x5cc   :  { %2637 = vmatpush3.bf16.msra.mxu1 %v1092_v49 }
 0x5cd   :  { %2638 = vmatprep.subr.bf16.mxu1 %v1090_v50 }
 0x5d0   :  { %2639 = vmatpush3.bf16.msra.mxu1 %v1090_v50 }
 0x5d1   :  { %2640 = vmatprep.subr.bf16.mxu1 %v1088_v52 }
 0x5d4   :  { %2641 = vmatpush3.bf16.msra.mxu1 %v1088_v52 }
 0x5d5   :  { %2642 = vmatprep.subr.bf16.mxu1 %v1086_v54 }
 0x5d8   :  { %2643 = vmatpush3.bf16.msra.mxu1 %v1086_v54 }
 0x5d9   :  { %2644 = vmatprep.subr.bf16.mxu1 %v1084_v55 }
 0x5dc   :  { %2645 = vmatpush3.bf16.msra.mxu1 %v1084_v55 }
 0x5df   :  { %2647 = vmatmul.mubr.bf16.vlgmr.msra.gmra.mxu1 %v2848_v56 }
 0x65f   :  { %v2588_v58 = vpop.f32.mrf.mxu1 }
 0x661   :  { %v898_v59 = vpop.f32.mrf.mxu1 }
 0x663   :  { %v2589_v61 = vpop.f32.mrf.mxu1 }
 0x665   :  { %v901_v62 = vpop.f32.mrf.mxu1 }
 0x66f   :  { %v2628_v4 = vpop.f32.mrf.mxu0 }
 0x671   :  { %v1048_v5 = vpop.f32.mrf.mxu0 }
 0x673   :  { %v2629_v51 = vpop.f32.mrf.mxu0 }
 0x675   :  { %v1051_v13 = vpop.f32.mrf.mxu0 }
 0x67f   :  { %v2608_v0 = vpop.f32.mrf.mxu1 }
 0x680   :  { %v968_v2 = vadd.f32 %v2608_v0, %v2588_v58 }
 0x681   :  { %v959_v1 = vpop.f32.mrf.mxu1 }
 0x682   :  { %v960_v6 = vadd.f32 %v959_v1, %v898_v59  ;;  %v1065_v63 = vadd.f32 %v2628_v4, %v968_v2 }
 0x683   :  { %v2609_v9 = vpop.f32.mrf.mxu1 }
 0x684   :  { %v971_v7 = vadd.f32 %v2609_v9, %v2589_v61  ;;  %v1063_v11 = vadd.f32 %v1048_v5, %v960_v6 }
 0x685   :  { %v962_v3 = vpop.f32.mrf.mxu1 }
 0x686   :  { %v963_v12 = vadd.f32 %v962_v3, %v901_v62  ;;  %v1066_v15 = vadd.f32 %v2629_v51, %v971_v7 }
 0x688   :  { %v1064_v19 = vadd.f32 %v1051_v13, %v963_v12 }
 0x69f   :  { %v2648_v53 = vpop.f32.mrf.mxu1 }
 0x6a0   :  { %v1158_v17 = vadd.f32 %v2648_v53, %v1065_v63 }
 0x6a1   :  { %v1141_v14 = vpop.f32.mrf.mxu1 }
 0x6a2   :  { %v1156_v16 = vadd.f32 %v1141_v14, %v1063_v11  ;;  %v1186_v31 = vadd.f32 %v1177_v60, %v1158_v17 }
 0x6a3   :  { %v2649_v18 = vpop.f32.mrf.mxu1 }
 0x6a4   :  { %v1184_v24 = vadd.f32 %v1167_v8, %v1156_v16  ;;  %v1159_v25 = vadd.f32 %v2649_v18, %v1066_v15  ;;  %v3433_v38 = vmax.f32 %v1186_v31, 0.0 }
 0x6a5   :  { %v1144_v26 = vpop.f32.mrf.mxu1 }
 0x6a6   :  { %v3425_v29 = vmax.f32 %v1184_v24, 0.0  ;;  %v1157_v30 = vadd.f32 %v1144_v26, %v1064_v19  ;;  %v1187_v33 = vadd.f32 %v1182_v32, %v1159_v25  ;;  %v1199_v43 = vsel %vm1192_vm5, %v3433_v38, 0.0 }
 0x6a7   :  { %v1207_v45 = vmul.f32 %v3433_v38, %v3433_v38 }
 0x6a8   :  { %v1185_v34 = vadd.f32 %v1172_v28, %v1157_v30  ;;  %v1193_v35 = vsel %vm1192_vm5, %v3425_v29, 0.0  ;;  %v1205_v36 = vmul.f32 %v3425_v29, %v3425_v29  ;;  %v3435_v39 = vmax.f32 %v1187_v33, 0.0 }
 0x6a9   :  { %1194 = vadd.xlane.f32.xlu0 %v1193_v35  ;;  %v1215_v47 = vsel %vm1192_vm5, %v1207_v45, 0.0  ;;  %v1329_v45 = vld [vmem:[%s3816_s8 + $0x20] sm:$0xff] }
 0x6aa   :  { %v3431_v37 = vmax.f32 %v1185_v34, 0.0  ;;  %v1209_v40 = vsel %vm1192_vm5, %v1205_v36, 0.0  ;;  %v1202_v42 = vsel %vm1192_vm5, %v3435_v39, 0.0  ;;  %v1208_v48 = vmul.f32 %v3435_v39, %v3435_v39 }
 0x6ac   :  { %v1196_v41 = vsel %vm1192_vm5, %v3431_v37, 0.0  ;;  %v1206_v44 = vmul.f32 %v3431_v37, %v3431_v37  ;;  %v1218_v49 = vsel %vm1192_vm5, %v1208_v48, 0.0 }
 0x6ad   :  { %1210 = vadd.xlane.f32.xlu0 %v1209_v40  ;;  %1197 = vadd.xlane.f32.xlu1 %v1196_v41  ;;  %v1333_v41 = vld [vmem:[%s3816_s8 + $0x40] sm:$0x3] }
 0x6ae   :  { %v1212_v46 = vsel %vm1192_vm5, %v1206_v44, 0.0  ;;  %2650 = vmatprep.subr.msk.mxu0 %vm718_vm4, %v1333_v41  ;;  %v1330_v44 = vld [vmem:[%s3816_s8 + $0x28] sm:$0xff] }
 0x6af   :  { %2651 = vmatpush3.msk.msra.mxu0 %vm718_vm4, %v1333_v41 }
 0x6b1   :  { %1203 = vadd.xlane.f32.xlu0 %v1202_v42  ;;  %1200 = vadd.xlane.f32.xlu1 %v1199_v43  ;;  %v1332_v42 = vld [vmem:[%s3816_s8 + $0x38] sm:$0xff]  ;;  %v1331_v43 = vld [vmem:[%s3816_s8 + $0x30] sm:$0xff] }
 0x6b2   :  { %2652 = vmatprep.subr.mxu0 %v1332_v42 }
 0x6b3   :  { %2653 = vmatpush3.msra.mxu0 %v1332_v42 }
 0x6b4   :  { %2654 = vmatprep.subr.mxu0 %v1331_v43 }
 0x6b5   :  { %1213 = vadd.xlane.f32.xlu0 %v1212_v46  ;;  %1216 = vadd.xlane.f32.xlu1 %v1215_v47  ;;  %v1328_v46 = vld [vmem:[%s3816_s8 + $0x18] sm:$0xff] }
 0x6b6   :  { %2655 = vmatpush3.msra.mxu0 %v1331_v43 }
 0x6b7   :  { %2656 = vmatprep.subr.mxu0 %v1330_v44 }
 0x6b8   :  { %2657 = vmatpush3.msra.mxu0 %v1330_v44 }
 0x6b9   :  { %1219 = vadd.xlane.f32.xlu0 %v1218_v49  ;;  %2658 = vmatprep.subr.mxu0 %v1329_v45  ;;  %v1327_v49 = vld [vmem:[%s3816_s8 + $0x10] sm:$0xff] }
 0x6ba   :  { %2659 = vmatpush3.msra.mxu0 %v1329_v45 }
 0x6bb   :  { %2660 = vmatprep.subr.mxu0 %v1328_v46 }
 0x6bc   :  { %2661 = vmatpush3.msra.mxu0 %v1328_v46 }
 0x6bd   :  { %2662 = vmatprep.subr.mxu0 %v1327_v49 }
 0x6be   :  { %2663 = vmatpush3.msra.mxu0 %v1327_v49 }
 0x732   :  { %v1195_v50 = vpop.xlane.xlu0 %1194 }
 0x733   :  { %v1221_v52 = vmul.f32 0.015151516, %v1195_v50  ;;  %v1326_v50 = vld [vmem:[%s3816_s8 + $0x8] sm:$0xff] }
 0x734   :  { %2664 = vmatprep.subr.mxu0 %v1326_v50 }
 0x735   :  { %v1229_v56 = vmul.f32 %v1221_v52, %v1221_v52  ;;  %2665 = vmatpush3.msra.mxu0 %v1326_v50 }
 0x736   :  { %v1211_v54 = vpop.xlane.xlu0 %1210  ;;  %v1198_v55 = vpop.xlane.xlu1 %1197 }
 0x737   :  { %v1225_v58 = vmul.f32 0.015151516, %v1211_v54  ;;  %v1222_v61 = vmul.f32 0.015151516, %v1198_v55 }
 0x739   :  { %v1233_v59 = vsub.f32 %v1225_v58, %v1229_v56  ;;  %v1230_v5 = vmul.f32 %v1222_v61, %v1222_v61 }
 0x73a   :  { %v1204_v62 = vpop.xlane.xlu0 %1203  ;;  %v1201_v0 = vpop.xlane.xlu1 %1200 }
 0x73b   :  { %v1237_v1 = vmax.f32 %v1233_v59, 0.0  ;;  %v1223_v4 = vmul.f32 0.015151516, %v1201_v0  ;;  %v1224_v8 = vmul.f32 0.015151516, %v1204_v62 }
 0x73d   :  { %v1241_v9 = vadd.f32 1e-05, %v1237_v1  ;;  %v1231_v3 = vmul.f32 %v1223_v4, %v1223_v4  ;;  %v1232_v60 = vmul.f32 %v1224_v8, %v1224_v8 }
 0x73e   :  { %v1214_v6 = vpop.xlane.xlu0 %1213  ;;  %v1217_v2 = vpop.xlane.xlu1 %1216 }
 0x73f   :  { %2869 = vrsqrt.f32 %v1241_v9  ;;  %v1226_v51 = vmul.f32 0.015151516, %v1214_v6  ;;  %v1227_v7 = vmul.f32 0.015151516, %v1217_v2 }
 0x741   :  { %v1234_v53 = vsub.f32 %v1226_v51, %v1230_v5  ;;  %v1235_v11 = vsub.f32 %v1227_v7, %v1231_v3 }
 0x742   :  { %v1220_v12 = vpop.xlane.xlu0 %1219 }
 0x743   :  { %v1238_v63 = vmax.f32 %v1234_v53, 0.0  ;;  %v1239_v13 = vmax.f32 %v1235_v11, 0.0  ;;  %v1228_v14 = vmul.f32 0.015151516, %v1220_v12  ;;  %v2849_v12 = vld [vmem:[%s3817_s3] ss:$16 sps:$4 sm:$0xff]  }
 0x744   :  { %2714 = vmatprep.mubr.bf16.mxu1 %v2849_v12 }
 0x745   :  { %v1242_v15 = vadd.f32 1e-05, %v1238_v63  ;;  %v1243_v16 = vadd.f32 1e-05, %v1239_v13  ;;  %v1236_v17 = vsub.f32 %v1228_v14, %v1232_v60 }
 0x747   :  { %2871 = vrsqrt.f32 %v1242_v15  ;;  %v1240_v18 = vmax.f32 %v1236_v17, 0.0  ;;  %v2850_v17 = vld [vmem:[%s3817_s3 + $0x20] ss:$16 sps:$4 sm:$0xff]  }
 0x748   :  { %2873 = vrsqrt.f32 %v1243_v16  ;;  %v2851_v16 = vld [vmem:[%s3817_s3 + $0x4] ss:$16 sps:$4 sm:$0xff]  }
 0x749   :  { %v1244_v19 = vadd.f32 1e-05, %v1240_v18  ;;  %v2854_v18 = vld [vmem:[%s3817_s3 + $0x40] ss:$16 sps:$4 sm:$0xff]  }
 0x74b   :  { %2875 = vrsqrt.f32 %v1244_v19  ;;  %v2856_v19 = vld [vmem:[%s3817_s3 + $0x60] ss:$16 sps:$4 sm:$0xff]  }
 0x74c   :  { %v2870_v24 = vpop.eup %2869 }
 0x74d   :  { %v1249_v25 = vmul.f32 %v2870_v24, %v3368_v20  ;;  %v2857_v24 = vld [vmem:[%s3817_s3 + $0xc] ss:$16 sps:$4 sm:$0xff]  }
 0x74f   :  { %v1253_v26 = vmul.f32 %v1249_v25, %v1221_v52 }
 0x751   :  { %1261 = vrot.lane.b32.xlu1 %v1253_v26, %s2914_s1  ;;  %v3574_v26 = vld [vmem:[%s3818_s6] sm:$0xff] }
 0x754   :  { %v2872_v28 = vpop.eup %2871 }
 0x755   :  { %v2874_v30 = vpop.eup %2873  ;;  %v1250_v31 = vmul.f32 %v2872_v28, %v3374_v21  ;;  %v3581_v28 = vld [vmem:[%s3818_s6 + $0x10] sm:$0xff] }
 0x756   :  { %v1251_v32 = vmul.f32 %v2874_v30, %v3379_v22  ;;  %v3586_v30 = vld [vmem:[%s3818_s6 + $0x18] sm:$0xff] }
 0x757   :  { %v1254_v33 = vmul.f32 %v1250_v31, %v1222_v61 }
 0x758   :  { %v2876_v34 = vpop.eup %2875  ;;  %v1255_v35 = vmul.f32 %v1251_v32, %v1223_v4 }
 0x759   :  { %1263 = vrot.lane.b32.xlu0 %v1254_v33, %s2914_s1  ;;  %v1252_v36 = vmul.f32 %v2876_v34, %v3386_v23  ;;  %v3605_v33 = vld [vmem:[%s3818_s6 + $0x30] sm:$0xff]  ;;  %v3610_v34 = vld [vmem:[%s3818_s6 + $0x38] sm:$0xff] }
 0x75a   :  { %1265 = vrot.lane.b32.xlu1 %v1255_v35, %s2914_s1 }
 0x75b   :  { %v1256_v40 = vmul.f32 %v1252_v36, %v1224_v8 }
 0x75d   :  { %1279 = vperm.xlu0 %2823, %v1249_v25   ;;  %v3569_v25 = vld [vmem:[%s3818_s6 + $0x8] sm:$0xff] }
 0x75e   :  { %1267 = vrot.lane.b32.xlu1 %v1256_v40, %s2914_s1 }
 0x761   :  { %2827 = vset.pattern.permute.xlu0 %v2913_v27 }
 0x762   :  { %1284 = vperm.xlu1 %2824, %v1250_v31   ;;  %v3593_v31 = vld [vmem:[%s3818_s6 + $0x20] sm:$0xff] }
 0x766   :  { %1289 = vperm.xlu1 %2824, %v1251_v32   ;;  %v3598_v32 = vld [vmem:[%s3818_s6 + $0x28] sm:$0xff] }
 0x76a   :  { %2825 = vset.pattern.permute.xlu1 %v2913_v27 }
 0x7c3   :  { %v1262_v47 = vpop.permute.xlu1 %1261 }
 0x7c4   :  { %v1273_v48 = vsub.f32 %v3368_v20, %v1262_v47  ;;  %v1325_v20 = vld [vmem:[%s3816_s8] sm:$0xff] }
 0x7c5   :  { %2666 = vmatprep.subr.mxu0 %v1325_v20 }
 0x7c6   :  { %1303 = vperm.xlu1 %2825, %v1273_v48   ;;  %2667 = vmatpush3.msra.mxu0 %v1325_v20 }
 0x7ca   :  { %2826 = vset.pattern.permute.xlu1 %v2912_v10 }
 0x7cb   :  { %v1264_v52 = vpop.permute.xlu0 %1263  ;;  %1294 = vperm.xlu1 %2826, %v1252_v36  }
 0x7cc   :  { %v1274_v54 = vsub.f32 %v3374_v21, %v1264_v52  ;;  %v1266_v55 = vpop.permute.xlu1 %1265 }
 0x7cd   :  { %v1275_v56 = vsub.f32 %v3379_v22, %v1266_v55  ;;  %v2852_v55 = vld [vmem:[%s3817_s3 + $0x24] ss:$16 sps:$4 sm:$0xff]  }
 0x7ce   :  { %1308 = vperm.xlu0 %2827, %v1274_v54  }
 0x7cf   :  { %2828 = vset.pattern.permute.xlu1 %v2913_v27 }
 0x7d0   :  { %v1268_v58 = vpop.permute.xlu1 %1267 }
 0x7d1   :  { %v1276_v59 = vsub.f32 %v3386_v23, %v1268_v58 }
 0x7d2   :  { %1313 = vperm.xlu0 %2827, %v1275_v56   ;;  %v2853_v56 = vld [vmem:[%s3817_s3 + $0x44] ss:$16 sps:$4 sm:$0xff]  }
 0x7d3   :  { %1318 = vperm.xlu1 %2828, %v1276_v59  }
 0x7d6   :  { %2829 = vset.pattern.permute.xlu0 %v2909_v57 }
 0x7d7   :  { %2830 = vset.pattern.permute.xlu1 %v2909_v57 }
 0x7d8   :  { %v1280_v62 = vpop.permute.xlu0 %1279 }
 0x7d9   :  { %v1297_v21 = vmul.f32 %v1280_v62, %v3425_v29  ;;  %v2855_v62 = vld [vmem:[%s3817_s3 + $0x64] ss:$16 sps:$4 sm:$0xff]  }
 0x7dd   :  { %v1285_v61 = vpop.permute.xlu1 %1284 }
 0x7de   :  { %v1298_v22 = vmul.f32 %v1285_v61, %v3431_v37 }
 0x7e1   :  { %v1290_v0 = vpop.permute.xlu1 %1289 }
 0x7e2   :  { %v1299_v8 = vmul.f32 %v1290_v0, %v3433_v38  ;;  %v2859_v0 = vld [vmem:[%s3817_s3 + $0x8] ss:$16 sps:$4 sm:$0xff]  }
 0x841   :  { %v1304_v1 = vpop.permute.xlu1 %1303 }
 0x842   :  { %v1321_v4 = vadd.f32 %v1304_v1, %v1297_v21 }
 0x844   :  { %2668 = vmatprep.mubr.msk.f32.mxu0 %vm1192_vm5, %v1321_v4  ;;  %v2858_v4 = vld [vmem:[%s3817_s3 + $0x2c] ss:$16 sps:$4 sm:$0xff]  }
 0x846   :  { %v1295_v5 = vpop.permute.xlu1 %1294 }
 0x847   :  { %v1300_v57 = vmul.f32 %v1295_v5, %v3435_v39  ;;  %v2864_v5 = vld [vmem:[%s3817_s3 + $0x6c] ss:$16 sps:$4 sm:$0xff]  }
 0x849   :  { %v1309_v9 = vpop.permute.xlu0 %1308 }
 0x84a   :  { %v1322_v23 = vadd.f32 %v1309_v9, %v1298_v22  ;;  %v2863_v22 = vld [vmem:[%s3817_s3 + $0x4c] ss:$16 sps:$4 sm:$0xff]  }
 0x84c   :  { %2669 = vmatmul.mubr.msk.f32.vlgmr.msra.gmra.mxu0 %vm1192_vm5, %v1322_v23 }
 0x84d   :  { %v1314_v6 = vpop.permute.xlu0 %1313 }
 0x84e   :  { %v1323_v2 = vadd.f32 %v1314_v6, %v1299_v8  ;;  %v1319_v3 = vpop.permute.xlu1 %1318  ;;  %v2861_v6 = vld [vmem:[%s3817_s3 + $0x48] ss:$16 sps:$4 sm:$0xff]  }
 0x84f   :  { %v1324_v51 = vadd.f32 %v1319_v3, %v1300_v57  ;;  %v2860_v57 = vld [vmem:[%s3817_s3 + $0x28] ss:$16 sps:$4 sm:$0xff]  }
 0x850   :  { %2671 = vmatprep.mubr.msk.f32.mxu0 %vm1192_vm5, %v1323_v2  ;;  %v2862_v2 = vld [vmem:[%s3817_s3 + $0x68] ss:$16 sps:$4 sm:$0xff]  }
 0x851   :  { %2672 = vmatmul.mubr.msk.f32.gmra.mxu0 %vm1192_vm5, %v1324_v51 }
 0x852   :  { %2690 = vmatprep.mubr.bf16.mxu0 %v2851_v16 }
 0x90c   :  { %v2670_v29 = vpop.f32.mrf.mxu0 }
 0x90e   :  { %v1415_v7 = vpop.f32.mrf.mxu0 }
 0x90f   :  { %v3508_v37 = vpack.c.bf16 %v2670_v29, %v1415_v7 }
 0x911   :  { %1450 = vrot.lane.b32.xlu1 %v3508_v37, %s2906_s29  ;;  %v2673_v38 = vpop.f32.mrf.mxu0 }
 0x913   :  { %v1425_v53 = vpop.f32.mrf.mxu0 }
 0x914   :  { %v1435_v11 = vpack.c.bf16 %v2673_v38, %v1425_v53 }
 0x915   :  { %1444 = vrot.lane.b32.xlu1 %v3508_v37, %s2905_s28 }
 0x916   :  { %1452 = vrot.lane.b32.xlu0 %v1435_v11, %s2906_s29 }
 0x919   :  { %1438 = vrot.lane.b32.xlu1 %v3508_v37, %s2907_s30 }
 0x91a   :  { %1446 = vrot.lane.b32.xlu0 %v1435_v11, %s2905_s28 }
 0x91e   :  { %1440 = vrot.lane.b32.xlu0 %v1435_v11, %s2907_s30 }
 0x983   :  { %v1451_v39 = vpop.permute.xlu1 %1450 }
 0x984   :  { %1508 = vrot.lane.b32.xlu1 %v1451_v39, %s2903_s26 }
 0x987   :  { %v1445_v60 = vpop.permute.xlu1 %1444 }
 0x988   :  { %v1453_v63 = vpop.permute.xlu0 %1452  ;;  %1504 = vrot.lane.b32.xlu1 %v1445_v60, %s2903_s26 }
 0x989   :  { %2698 = vmatprep.subr.bf16.mxu1 %v1453_v63  ;;  %1510 = vrot.lane.b32.xlu0 %v1453_v63, %s2903_s26 }
 0x98a   :  { %2699 = vmatpush3.bf16.msra.mxu1 %v1453_v63 }
 0x98b   :  { %2700 = vmatprep.subr.bf16.mxu1 %v1451_v39  ;;  %v1439_v13 = vpop.permute.xlu1 %1438 }
 0x98c   :  { %v1447_v14 = vpop.permute.xlu0 %1446  ;;  %1500 = vrot.lane.b32.xlu1 %v1439_v13, %s2903_s26 }
 0x98d   :  { %1506 = vrot.lane.b32.xlu0 %v1447_v14, %s2903_s26 }
 0x98e   :  { %2701 = vmatpush3.bf16.msra.mxu1 %v1451_v39 }
 0x98f   :  { %2702 = vmatprep.subr.bf16.mxu1 %v1447_v14 }
 0x990   :  { %v1441_v15 = vpop.permute.xlu0 %1440  ;;  %1496 = vrot.lane.b32.xlu1 %v3508_v37, %s2903_s26 }
 0x991   :  { %1502 = vrot.lane.b32.xlu0 %v1441_v15, %s2903_s26 }
 0x992   :  { %2703 = vmatpush3.bf16.msra.mxu1 %v1447_v14 }
 0x993   :  { %2704 = vmatprep.subr.bf16.mxu1 %v1445_v60 }
 0x994   :  { %1849 = vrot.lane.b32.xlu1 %v1453_v63, %s2895_s19 }
 0x995   :  { %1498 = vrot.lane.b32.xlu0 %v1435_v11, %s2903_s26 }
 0x996   :  { %2705 = vmatpush3.bf16.msra.mxu1 %v1445_v60 }
 0x997   :  { %2706 = vmatprep.subr.bf16.mxu1 %v1441_v15 }
 0x998   :  { %1847 = vrot.lane.b32.xlu1 %v1451_v39, %s2895_s19 }
 0x999   :  { %1720 = vrot.lane.b32.xlu0 %v1453_v63, %s2899_s22 }
 0x99a   :  { %2707 = vmatpush3.bf16.msra.mxu1 %v1441_v15 }
 0x99b   :  { %2708 = vmatprep.subr.bf16.mxu1 %v1439_v13 }
 0x99c   :  { %1845 = vrot.lane.b32.xlu1 %v1447_v14, %s2895_s19 }
 0x99d   :  { %1718 = vrot.lane.b32.xlu0 %v1451_v39, %s2899_s22 }
 0x99e   :  { %2709 = vmatpush3.bf16.msra.mxu1 %v1439_v13 }
 0x99f   :  { %2710 = vmatprep.subr.bf16.mxu1 %v1435_v11 }
 0x9a0   :  { %1843 = vrot.lane.b32.xlu1 %v1445_v60, %s2895_s19 }
 0x9a1   :  { %1716 = vrot.lane.b32.xlu0 %v1447_v14, %s2899_s22 }
 0x9a2   :  { %2711 = vmatpush3.bf16.msra.mxu1 %v1435_v11 }
 0x9a3   :  { %2712 = vmatprep.subr.bf16.mxu1 %v3508_v37 }
 0x9a4   :  { %1841 = vrot.lane.b32.xlu1 %v1441_v15, %s2895_s19 }
 0x9a5   :  { %1714 = vrot.lane.b32.xlu0 %v1445_v60, %s2899_s22 }
 0x9a6   :  { %2713 = vmatpush3.bf16.msra.mxu1 %v3508_v37 }
 0x9a8   :  { %1839 = vrot.lane.b32.xlu1 %v1439_v13, %s2895_s19 }
 0x9a9   :  { %1712 = vrot.lane.b32.xlu0 %v1441_v15, %s2899_s22  ;;  %2715 = vmatmul.mubr.bf16.vlgmr.msra.gmra.mxu1 %v2850_v17 }
 0x9aa   :  { %2718 = vmatprep.mubr.bf16.mxu1 %v2854_v18 }
 0x9ac   :  { %1837 = vrot.lane.b32.xlu1 %v1435_v11, %s2895_s19 }
 0x9ad   :  { %1710 = vrot.lane.b32.xlu0 %v1439_v13, %s2899_s22 }
 0x9b0   :  { %1835 = vrot.lane.b32.xlu1 %v3508_v37, %s2895_s19 }
 0x9b1   :  { %1708 = vrot.lane.b32.xlu0 %v1435_v11, %s2899_s22  ;;  %2719 = vmatmul.mubr.bf16.gmra.mxu1 %v2856_v19 }
 0x9b2   :  { %2762 = vmatprep.mubr.bf16.mxu1 %v2857_v24 }
 0x9b4   :  { %1947 = vperm.xlu1 %2830, %v3569_v25  }
 0x9b5   :  { %1706 = vrot.lane.b32.xlu0 %v3508_v37, %s2899_s22 }
 0x9b8   :  { %1952 = vperm.xlu1 %2830, %v3581_v28  }
 0x9b9   :  { %1942 = vperm.xlu0 %2829, %v3574_v26  }
 0x9bc   :  { %1962 = vperm.xlu1 %2830, %v3593_v31  }
 0x9bd   :  { %1957 = vperm.xlu0 %2829, %v3586_v30  }
 0x9c0   :  { %1972 = vperm.xlu1 %2830, %v3605_v33  }
 0x9c1   :  { %1967 = vperm.xlu0 %2829, %v3598_v32  }
 0x9c4   :  { %2831 = vset.pattern.permute.xlu1 %v2912_v10 }
 0x9c5   :  { %1977 = vperm.xlu0 %2829, %v3610_v34  }
 0x9c9   :  { %2832 = vset.pattern.permute.xlu0 %v2912_v10 }
 0x9f6   :  { %v1509_v35 = vpop.permute.xlu1 %1508 }
 0x9fa   :  { %v1505_v36 = vpop.permute.xlu1 %1504 }
 0x9fb   :  { %v1511_v40 = vpop.permute.xlu0 %1510 }
 0x9fc   :  { %2674 = vmatprep.subr.bf16.mxu0 %v1511_v40 }
 0x9fd   :  { %2675 = vmatpush3.bf16.msra.mxu0 %v1511_v40 }
 0x9fe   :  { %2676 = vmatprep.subr.bf16.mxu0 %v1509_v35  ;;  %v1501_v41 = vpop.permute.xlu1 %1500 }
 0x9ff   :  { %v1507_v42 = vpop.permute.xlu0 %1506 }
 0xa01   :  { %2677 = vmatpush3.bf16.msra.mxu0 %v1509_v35 }
 0xa02   :  { %2678 = vmatprep.subr.bf16.mxu0 %v1507_v42  ;;  %v1497_v43 = vpop.permute.xlu1 %1496 }
 0xa03   :  { %v1503_v44 = vpop.permute.xlu0 %1502 }
 0xa05   :  { %2679 = vmatpush3.bf16.msra.mxu0 %v1507_v42 }
 0xa06   :  { %2680 = vmatprep.subr.bf16.mxu0 %v1505_v36  ;;  %v1850_v45 = vpop.permute.xlu1 %1849 }
 0xa07   :  { %v1499_v46 = vpop.permute.xlu0 %1498  ;;  %2746 = vmatprep.subr.bf16.mxu1 %v1850_v45 }
 0xa08   :  { %2747 = vmatpush3.bf16.msra.mxu1 %v1850_v45 }
 0xa09   :  { %2681 = vmatpush3.bf16.msra.mxu0 %v1505_v36 }
 0xa0a   :  { %2682 = vmatprep.subr.bf16.mxu0 %v1503_v44  ;;  %v1848_v47 = vpop.permute.xlu1 %1847 }
 0xa0b   :  { %v1721_v48 = vpop.permute.xlu0 %1720  ;;  %2748 = vmatprep.subr.bf16.mxu1 %v1848_v47 }
 0xa0c   :  { %2749 = vmatpush3.bf16.msra.mxu1 %v1848_v47 }
 0xa0d   :  { %2683 = vmatpush3.bf16.msra.mxu0 %v1503_v44 }
 0xa0e   :  { %2684 = vmatprep.subr.bf16.mxu0 %v1501_v41  ;;  %v1846_v49 = vpop.permute.xlu1 %1845 }
 0xa0f   :  { %2750 = vmatprep.subr.bf16.mxu1 %v1846_v49  ;;  %v1719_v50 = vpop.permute.xlu0 %1718 }
 0xa10   :  { %2751 = vmatpush3.bf16.msra.mxu1 %v1846_v49 }
 0xa11   :  { %2685 = vmatpush3.bf16.msra.mxu0 %v1501_v41 }
 0xa12   :  { %2686 = vmatprep.subr.bf16.mxu0 %v1499_v46  ;;  %v1844_v20 = vpop.permute.xlu1 %1843 }
 0xa13   :  { %2752 = vmatprep.subr.bf16.mxu1 %v1844_v20  ;;  %v1717_v54 = vpop.permute.xlu0 %1716 }
 0xa14   :  { %2753 = vmatpush3.bf16.msra.mxu1 %v1844_v20 }
 0xa15   :  { %2687 = vmatpush3.bf16.msra.mxu0 %v1499_v46 }
 0xa16   :  { %2688 = vmatprep.subr.bf16.mxu0 %v1497_v43  ;;  %v1842_v52 = vpop.permute.xlu1 %1841 }
 0xa17   :  { %2754 = vmatprep.subr.bf16.mxu1 %v1842_v52  ;;  %v1715_v59 = vpop.permute.xlu0 %1714 }
 0xa18   :  { %2755 = vmatpush3.bf16.msra.mxu1 %v1842_v52 }
 0xa19   :  { %2689 = vmatpush3.bf16.msra.mxu0 %v1497_v43 }
 0xa1a   :  { %2722 = vmatprep.subr.bf16.mxu0 %v1721_v48  ;;  %v1840_v58 = vpop.permute.xlu1 %1839 }
 0xa1b   :  { %2756 = vmatprep.subr.bf16.mxu1 %v1840_v58  ;;  %v1713_v1 = vpop.permute.xlu0 %1712 }
 0xa1c   :  { %2691 = vmatmul.mubr.bf16.vlgmr.msra.gmra.mxu0 %v2852_v55  ;;  %2757 = vmatpush3.bf16.msra.mxu1 %v1840_v58 }
 0xa1d   :  { %2723 = vmatpush3.bf16.msra.mxu0 %v1721_v48  ;;  %2694 = vmatprep.mubr.bf16.mxu0 %v2853_v56 }
 0xa1e   :  { %2724 = vmatprep.subr.bf16.mxu0 %v1719_v50  ;;  %v1838_v61 = vpop.permute.xlu1 %1837 }
 0xa1f   :  { %2758 = vmatprep.subr.bf16.mxu1 %v1838_v61  ;;  %v1711_v9 = vpop.permute.xlu0 %1710 }
 0xa20   :  { %2759 = vmatpush3.bf16.msra.mxu1 %v1838_v61 }
 0xa21   :  { %2725 = vmatpush3.bf16.msra.mxu0 %v1719_v50 }
 0xa22   :  { %2726 = vmatprep.subr.bf16.mxu0 %v1717_v54  ;;  %v1836_v21 = vpop.permute.xlu1 %1835 }
 0xa23   :  { %2760 = vmatprep.subr.bf16.mxu1 %v1836_v21  ;;  %v1709_v23 = vpop.permute.xlu0 %1708 }
 0xa24   :  { %2761 = vmatpush3.bf16.msra.mxu1 %v1836_v21  ;;  %2695 = vmatmul.mubr.bf16.gmra.mxu0 %v2855_v62 }
 0xa25   :  { %2727 = vmatpush3.bf16.msra.mxu0 %v1717_v54  ;;  %2738 = vmatprep.mubr.bf16.mxu0 %v2859_v0 }
 0xa26   :  { %2728 = vmatprep.subr.bf16.mxu0 %v1715_v59 }
 0xa27   :  { %2763 = vmatmul.mubr.bf16.vlgmr.msra.gmra.mxu1 %v2858_v4  ;;  %v1707_v8 = vpop.permute.xlu0 %1706 }
 0xa28   :  { %2766 = vmatprep.mubr.bf16.mxu1 %v2863_v22 }
 0xa29   :  { %2729 = vmatpush3.bf16.msra.mxu0 %v1715_v59 }
 0xa2a   :  { %2730 = vmatprep.subr.bf16.mxu0 %v1713_v1 }
 0xa2d   :  { %2731 = vmatpush3.bf16.msra.mxu0 %v1713_v1 }
 0xa2e   :  { %2732 = vmatprep.subr.bf16.mxu0 %v1711_v9 }
 0xa2f   :  { %2767 = vmatmul.mubr.bf16.gmra.mxu1 %v2864_v5  ;;  %v1948_v18 = vpop.permute.xlu1 %1947 }
 0xa31   :  { %2733 = vmatpush3.bf16.msra.mxu0 %v1711_v9 }
 0xa32   :  { %2734 = vmatprep.subr.bf16.mxu0 %v1709_v23 }
 0xa33   :  { %v1953_v48 = vpop.permute.xlu1 %1952 }
 0xa34   :  { %v1943_v41 = vpop.permute.xlu0 %1942 }
 0xa35   :  { %2735 = vmatpush3.bf16.msra.mxu0 %v1709_v23 }
 0xa36   :  { %2736 = vmatprep.subr.bf16.mxu0 %v1707_v8 }
 0xa38   :  { %v1958_v58 = vpop.permute.xlu0 %1957 }
 0xa39   :  { %2737 = vmatpush3.bf16.msra.mxu0 %v1707_v8 }
 0xa3c   :  { %2739 = vmatmul.mubr.bf16.vlgmr.msra.gmra.mxu0 %v2860_v57 }
 0xa3d   :  { %2742 = vmatprep.mubr.bf16.mxu0 %v2861_v6 }
 0xa44   :  { %2743 = vmatmul.mubr.bf16.gmra.mxu0 %v2862_v2 }
 0xa69   :  { %v2716_v3 = vpop.f32.mrf.mxu1 }
 0xa6b   :  { %v1643_v51 = vpop.f32.mrf.mxu1 }
 0xa6d   :  { %v2717_v29 = vpop.f32.mrf.mxu1 }
 0xa6f   :  { %v1646_v37 = vpop.f32.mrf.mxu1 }
 0xa71   :  { %v2720_v53 = vpop.f32.mrf.mxu1 }
 0xa73   :  { %v1659_v39 = vpop.f32.mrf.mxu1 }
 0xa75   :  { %v2721_v60 = vpop.f32.mrf.mxu1 }
 0xa77   :  { %v1662_v13 = vpop.f32.mrf.mxu1 }
 0xadc   :  { %v2692_v7 = vpop.f32.mrf.mxu0 }
 0xadd   :  { %v1652_v24 = vadd.f32 %v2716_v3, %v2692_v7  ;;  %v1963_v3 = vpop.permute.xlu1 %1962 }
 0xade   :  { %v1554_v38 = vpop.f32.mrf.mxu0 }
 0xadf   :  { %v1644_v40 = vadd.f32 %v1643_v51, %v1554_v38 }
 0xae0   :  { %v2693_v11 = vpop.f32.mrf.mxu0 }
 0xae1   :  { %v1655_v44 = vadd.f32 %v2717_v29, %v2693_v11  ;;  %v1968_v11 = vpop.permute.xlu0 %1967 }
 0xae2   :  { %v1557_v12 = vpop.f32.mrf.mxu0 }
 0xae3   :  { %v1647_v50 = vadd.f32 %v1646_v37, %v1557_v12 }
 0xae4   :  { %v2696_v63 = vpop.f32.mrf.mxu0 }
 0xae5   :  { %v1668_v21 = vadd.f32 %v2720_v53, %v2696_v63 }
 0xae6   :  { %v1570_v14 = vpop.f32.mrf.mxu0 }
 0xae7   :  { %v2764_v15 = vpop.f32.mrf.mxu1  ;;  %v1660_v29 = vadd.f32 %v1659_v39, %v1570_v14 }
 0xae8   :  { %v2697_v16 = vpop.f32.mrf.mxu0 }
 0xae9   :  { %v1893_v17 = vpop.f32.mrf.mxu1  ;;  %v1671_v2 = vadd.f32 %v2721_v60, %v2697_v16 }
 0xaea   :  { %v1573_v19 = vpop.f32.mrf.mxu0 }
 0xaeb   :  { %v2765_v35 = vpop.f32.mrf.mxu1  ;;  %v1663_v53 = vadd.f32 %v1662_v13, %v1573_v19 }
 0xaed   :  { %v1896_v47 = vpop.f32.mrf.mxu1 }
 0xaef   :  { %v2768_v55 = vpop.f32.mrf.mxu1 }
 0xaf1   :  { %v1909_v5 = vpop.f32.mrf.mxu1 }
 0xaf3   :  { %v2769_v63 = vpop.f32.mrf.mxu1 }
 0xafc   :  { %v2740_v36 = vpop.f32.mrf.mxu0 }
 0xafd   :  { %v1797_v42 = vadd.f32 %v2740_v36, %v1652_v24  ;;  %v1912_v36 = vpop.f32.mrf.mxu1 }
 0xafe   :  { %v1764_v43 = vpop.f32.mrf.mxu0 }
 0xaff   :  { %v1926_v45 = vadd.f32 %v2764_v15, %v1797_v42  ;;  %v1795_v46 = vadd.f32 %v1764_v43, %v1644_v40  ;;  %v1978_v43 = vpop.permute.xlu0 %1977 }
 0xb00   :  { %v2741_v49 = vpop.f32.mrf.mxu0 }
 0xb01   :  { %v1982_v20 = vadd.f32 %v1953_v48, %v1926_v45  ;;  %v1924_v52 = vadd.f32 %v1893_v17, %v1795_v46  ;;  %v1798_v54 = vadd.f32 %v2741_v49, %v1655_v44 }
 0xb02   :  { %v1767_v56 = vpop.f32.mrf.mxu0 }
 0xb03   :  { %v3646_v59 = vmax.f32 %v1982_v20, 0.0  ;;  %v1980_v61 = vadd.f32 %v1943_v41, %v1924_v52  ;;  %v1927_v62 = vadd.f32 %v2765_v35, %v1798_v54  ;;  %v1796_v0 = vadd.f32 %v1767_v56, %v1647_v50  ;;  %v1973_v35 = vpop.permute.xlu1 %1972 }
 0xb04   :  { %v2744_v1 = vpop.f32.mrf.mxu0 }
 0xb05   :  { %v3648_v4 = vmax.f32 %v1980_v61, 0.0  ;;  %v1983_v22 = vadd.f32 %v1958_v58, %v1927_v62  ;;  %v1925_v9 = vadd.f32 %v1896_v47, %v1796_v0  ;;  %v1801_v23 = vadd.f32 %v2744_v1, %v1668_v21 }
 0xb06   :  { %v1780_v8 = vpop.f32.mrf.mxu0  ;;  %v2003_v57 = vsel %vm1996_vm6, %v3646_v59, 0.0  ;;  %v2023_v6 = vmul.f32 %v3646_v59, %v3646_v59 }
 0xb07   :  { %v1981_v51 = vadd.f32 %v1948_v18, %v1925_v9  ;;  %2004 = vadd.xlane.f32.xlu0 %v2003_v57  ;;  %v3654_v7 = vmax.f32 %v1983_v22, 0.0  ;;  %v1997_v38 = vsel %vm1996_vm6, %v3648_v4, 0.0  ;;  %v1799_v15 = vadd.f32 %v1780_v8, %v1660_v29 }
 0xb08   :  { %v2745_v37 = vpop.f32.mrf.mxu0  ;;  %1998 = vadd.xlane.f32.xlu1 %v1997_v38  ;;  %v1930_v17 = vadd.f32 %v2768_v55, %v1801_v23  ;;  %v2035_v60 = vsel %vm1996_vm6, %v2023_v6, 0.0  ;;  %v2021_v16 = vmul.f32 %v3648_v4, %v3648_v4 }
 0xb09   :  { %v1802_v12 = vadd.f32 %v2745_v37, %v1671_v2  ;;  %v3661_v39 = vmax.f32 %v1981_v51, 0.0  ;;  %v2006_v13 = vsel %vm1996_vm6, %v3654_v7, 0.0  ;;  %v2024_v19 = vmul.f32 %v3654_v7, %v3654_v7 }
 0xb0a   :  { %v1783_v24 = vpop.f32.mrf.mxu0  ;;  %v1986_v40 = vadd.f32 %v1973_v35, %v1930_v17  ;;  %v1928_v41 = vadd.f32 %v1909_v5, %v1799_v15  ;;  %v2029_v42 = vsel %vm1996_vm6, %v2021_v16, 0.0 }
 0xb0b   :  { %2036 = vadd.xlane.f32.xlu0 %v2035_v60  ;;  %v1800_v14 = vadd.f32 %v1783_v24, %v1663_v53  ;;  %v1931_v18 = vadd.f32 %v2769_v63, %v1802_v12  ;;  %v2038_v46 = vsel %vm1996_vm6, %v2024_v19, 0.0  ;;  %v2022_v47 = vmul.f32 %v3661_v39, %v3661_v39 }
 0xb0c   :  { %2007 = vadd.xlane.f32.xlu1 %v2006_v13  ;;  %v3671_v48 = vmax.f32 %v1986_v40, 0.0  ;;  %v1984_v49 = vadd.f32 %v1963_v3, %v1928_v41  ;;  %v2000_v50 = vsel %vm1996_vm6, %v3661_v39, 0.0 }
 0xb0d   :  { %v1987_v44 = vadd.f32 %v1978_v43, %v1931_v18  ;;  %v1929_v45 = vadd.f32 %v1912_v36, %v1800_v14  ;;  %v2032_v54 = vsel %vm1996_vm6, %v2022_v47, 0.0 }
 0xb0e   :  { %v3678_v55 = vmax.f32 %v1984_v49, 0.0  ;;  %v2015_v56 = vsel %vm1996_vm6, %v3671_v48, 0.0  ;;  %v2027_v9 = vmul.f32 %v3671_v48, %v3671_v48 }
 0xb0f   :  { %2030 = vadd.xlane.f32.xlu0 %v2029_v42  ;;  %v3675_v20 = vmax.f32 %v1987_v44, 0.0  ;;  %v1985_v52 = vadd.f32 %v1968_v11, %v1929_v45 }
 0xb10   :  { %2039 = vadd.xlane.f32.xlu1 %v2038_v46  ;;  %v2009_v62 = vsel %vm1996_vm6, %v3678_v55, 0.0  ;;  %v2025_v0 = vmul.f32 %v3678_v55, %v3678_v55  ;;  %v2047_v8 = vsel %vm1996_vm6, %v2027_v9, 0.0 }
 0xb11   :  { %v3682_v58 = vmax.f32 %v1985_v52, 0.0  ;;  %v2018_v61 = vsel %vm1996_vm6, %v3675_v20, 0.0  ;;  %v2028_v23 = vmul.f32 %v3675_v20, %v3675_v20 }
 0xb12   :  { %v2041_v22 = vsel %vm1996_vm6, %v2025_v0, 0.0 }
 0xb13   :  { %2001 = vadd.xlane.f32.xlu0 %v2000_v50  ;;  %v2012_v21 = vsel %vm1996_vm6, %v3682_v58, 0.0  ;;  %v2026_v1 = vmul.f32 %v3682_v58, %v3682_v58  ;;  %v2050_v57 = vsel %vm1996_vm6, %v2028_v23, 0.0 }
 0xb14   :  { %2033 = vadd.xlane.f32.xlu1 %v2032_v54 }
 0xb15   :  { %v2044_v5 = vsel %vm1996_vm6, %v2026_v1, 0.0 }
 0xb17   :  { %2016 = vadd.xlane.f32.xlu0 %v2015_v56 }
 0xb18   :  { %2019 = vadd.xlane.f32.xlu1 %v2018_v61 }
 0xb1b   :  { %2010 = vadd.xlane.f32.xlu0 %v2009_v62 }
 0xb1c   :  { %2013 = vadd.xlane.f32.xlu1 %v2012_v21 }
 0xb1f   :  { %2042 = vadd.xlane.f32.xlu0 %v2041_v22 }
 0xb20   :  { %2045 = vadd.xlane.f32.xlu1 %v2044_v5 }
 0xb23   :  { %2048 = vadd.xlane.f32.xlu0 %v2047_v8 }
 0xb24   :  { %2051 = vadd.xlane.f32.xlu1 %v2050_v57 }
 0xb90   :  { %v2005_v6 = vpop.xlane.xlu0 %2004 }
 0xb91   :  { %v1999_v2 = vpop.xlane.xlu1 %1998  ;;  %v3702_v3 = vmul.f32 0.029411765, %v2005_v6 }
 0xb92   :  { %v3704_v29 = vmul.f32 0.029411765, %v1999_v2 }
 0xb93   :  { %v2071_v11 = vmul.f32 %v3702_v3, %v3702_v3 }
 0xb94   :  { %v2037_v51 = vpop.xlane.xlu0 %2036  ;;  %v2069_v63 = vmul.f32 %v3704_v29, %v3704_v29 }
 0xb95   :  { %v2063_v37 = vmul.f32 0.029411765, %v2037_v51  ;;  %v2008_v38 = vpop.xlane.xlu1 %2007 }
 0xb96   :  { %v3706_v53 = vmul.f32 0.029411765, %v2008_v38 }
 0xb97   :  { %v2079_v17 = vsub.f32 %v2063_v37, %v2071_v11 }
 0xb98   :  { %v2031_v12 = vpop.xlane.xlu0 %2030  ;;  %v2072_v60 = vmul.f32 %v3706_v53, %v3706_v53 }
 0xb99   :  { %v2061_v15 = vmul.f32 0.029411765, %v2031_v12  ;;  %v2040_v24 = vpop.xlane.xlu1 %2039  ;;  %v2087_v36 = vmax.f32 %v2079_v17, 0.0 }
 0xb9a   :  { %v2064_v14 = vmul.f32 0.029411765, %v2040_v24 }
 0xb9b   :  { %v2077_v16 = vsub.f32 %v2061_v15, %v2069_v63  ;;  %v2095_v49 = vadd.f32 1e-05, %v2087_v36 }
 0xb9c   :  { %v2002_v18 = vpop.xlane.xlu0 %2001  ;;  %v2080_v19 = vsub.f32 %v2064_v14, %v2072_v60 }
 0xb9d   :  { %v2085_v13 = vmax.f32 %v2077_v16, 0.0  ;;  %v2054_v35 = vmul.f32 0.029411765, %v2002_v18  ;;  %v2034_v40 = vpop.xlane.xlu1 %2033 }
 0xb9e   :  { %v2088_v42 = vmax.f32 %v2080_v19, 0.0  ;;  %v2062_v44 = vmul.f32 0.029411765, %v2034_v40 }
 0xb9f   :  { %v2093_v41 = vadd.f32 1e-05, %v2085_v13  ;;  %v2070_v43 = vmul.f32 %v2054_v35, %v2054_v35 }
 0xba0   :  { %v2017_v45 = vpop.xlane.xlu0 %2016  ;;  %v2096_v46 = vadd.f32 1e-05, %v2088_v42 }
 0xba1   :  { %2877 = vrsqrt.f32 %v2093_v41  ;;  %v2078_v47 = vsub.f32 %v2062_v44, %v2070_v43  ;;  %v2020_v50 = vpop.xlane.xlu1 %2019  ;;  %v2059_v1 = vmul.f32 0.029411765, %v2017_v45 }
 0xba2   :  { %2879 = vrsqrt.f32 %v2096_v46  ;;  %v2060_v5 = vmul.f32 0.029411765, %v2020_v50 }
 0xba3   :  { %v2086_v52 = vmax.f32 %v2078_v47, 0.0  ;;  %2881 = vrsqrt.f32 %v2095_v49  ;;  %v2075_v51 = vmul.f32 %v2059_v1, %v2059_v1 }
 0xba4   :  { %v2011_v54 = vpop.xlane.xlu0 %2010  ;;  %v2076_v63 = vmul.f32 %v2060_v5, %v2060_v5 }
 0xba5   :  { %v2094_v56 = vadd.f32 1e-05, %v2086_v52  ;;  %v2057_v61 = vmul.f32 0.029411765, %v2011_v54  ;;  %v2014_v62 = vpop.xlane.xlu1 %2013 }
 0xba6   :  { %v2058_v0 = vmul.f32 0.029411765, %v2014_v62 }
 0xba7   :  { %2883 = vrsqrt.f32 %v2094_v56  ;;  %v2073_v22 = vmul.f32 %v2057_v61, %v2057_v61 }
 0xba8   :  { %v2043_v21 = vpop.xlane.xlu0 %2042  ;;  %v2074_v8 = vmul.f32 %v2058_v0, %v2058_v0 }
 0xba9   :  { %v2065_v9 = vmul.f32 0.029411765, %v2043_v21  ;;  %v2046_v23 = vpop.xlane.xlu1 %2045 }
 0xbaa   :  { %v2066_v6 = vmul.f32 0.029411765, %v2046_v23 }
 0xbab   :  { %v2081_v57 = vsub.f32 %v2065_v9, %v2073_v22 }
 0xbac   :  { %v2049_v2 = vpop.xlane.xlu0 %2048  ;;  %v2082_v38 = vsub.f32 %v2066_v6, %v2074_v8  ;;  %v2263_v6 = vld [vmem:[%s3819_s9 + $0x10] sm:$0xff] }
 0xbad   :  { %v2089_v37 = vmax.f32 %v2081_v57, 0.0  ;;  %v2067_v11 = vmul.f32 0.029411765, %v2049_v2  ;;  %v2052_v15 = vpop.xlane.xlu1 %2051  ;;  %v2262_v2 = vld [vmem:[%s3819_s9 + $0x8] sm:$0xff] }
 0xbae   :  { %v2878_v12 = vpop.eup %2877  ;;  %v2090_v24 = vmax.f32 %v2082_v38, 0.0  ;;  %v2068_v16 = vmul.f32 0.029411765, %v2052_v15 }
 0xbaf   :  { %v2097_v17 = vadd.f32 1e-05, %v2089_v37  ;;  %v2083_v60 = vsub.f32 %v2067_v11, %v2075_v51  ;;  %v2880_v14 = vpop.eup %2879  ;;  %v2109_v18 = vmul.f32 %v2878_v12, %v3574_v26 }
 0xbb0   :  { %v2098_v13 = vadd.f32 1e-05, %v2090_v24  ;;  %v2084_v36 = vsub.f32 %v2068_v16, %v2076_v63  ;;  %v2112_v41 = vmul.f32 %v2880_v14, %v3586_v30  ;;  %v2882_v42 = vpop.eup %2881 }
 0xbb1   :  { %2885 = vrsqrt.f32 %v2097_v17  ;;  %v2091_v19 = vmax.f32 %v2083_v60, 0.0  ;;  %v2117_v40 = vmul.f32 %v2109_v18, %v3704_v29  ;;  %v2111_v52 = vmul.f32 %v2882_v42, %v3581_v28 }
 0xbb2   :  { %2887 = vrsqrt.f32 %v2098_v13  ;;  %v2092_v44 = vmax.f32 %v2084_v36, 0.0  ;;  %v2120_v49 = vmul.f32 %v2112_v41, %v3706_v53 }
 0xbb3   :  { %v2099_v43 = vadd.f32 1e-05, %v2091_v19  ;;  %2133 = vrot.lane.b32.xlu0 %v2117_v40, %s2914_s1  ;;  %v2119_v29 = vmul.f32 %v2111_v52, %v3702_v3 }
 0xbb4   :  { %v2884_v45 = vpop.eup %2883  ;;  %v2100_v46 = vadd.f32 1e-05, %v2092_v44 }
 0xbb5   :  { %2889 = vrsqrt.f32 %v2099_v43  ;;  %v2110_v47 = vmul.f32 %v2884_v45, %v3569_v25 }
 0xbb6   :  { %2891 = vrsqrt.f32 %v2100_v46 }
 0xbb7   :  { %v2118_v50 = vmul.f32 %v2110_v47, %v2054_v35  ;;  %2139 = vrot.lane.b32.xlu0 %v2120_v49, %s2914_s1 }
 0xbb9   :  { %2135 = vrot.lane.b32.xlu1 %v2118_v50, %s2914_s1 }
 0xbbd   :  { %2137 = vrot.lane.b32.xlu1 %v2119_v29, %s2914_s1 }
 0xbbe   :  { %v2886_v54 = vpop.eup %2885 }
 0xbbf   :  { %v2113_v56 = vmul.f32 %v2886_v54, %v3593_v31  ;;  %v2888_v62 = vpop.eup %2887 }
 0xbc0   :  { %v2114_v22 = vmul.f32 %v2888_v62, %v3598_v32 }
 0xbc1   :  { %v2121_v21 = vmul.f32 %v2113_v56, %v2057_v61  ;;  %v2265_v61 = vld [vmem:[%s3819_s9 + $0x20] sm:$0x3] }
 0xbc2   :  { %v2890_v53 = vpop.eup %2889  ;;  %v2122_v35 = vmul.f32 %v2114_v22, %v2058_v0  ;;  %2770 = vmatprep.subr.msk.mxu0 %vm718_vm4, %v2265_v61  ;;  %v2264_v0 = vld [vmem:[%s3819_s9 + $0x18] sm:$0xff] }
 0xbc3   :  { %2141 = vrot.lane.b32.xlu1 %v2121_v21, %s2914_s1  ;;  %v2115_v9 = vmul.f32 %v2890_v53, %v3605_v33  ;;  %v2892_v23 = vpop.eup %2891  ;;  %2771 = vmatpush3.msk.msra.mxu0 %vm718_vm4, %v2265_v61 }
 0xbc4   :  { %2143 = vrot.lane.b32.xlu0 %v2122_v35, %s2914_s1  ;;  %v2116_v3 = vmul.f32 %v2892_v23, %v3610_v34  ;;  %2772 = vmatprep.subr.mxu0 %v2264_v0 }
 0xbc5   :  { %v2123_v8 = vmul.f32 %v2115_v9, %v2059_v1  ;;  %2773 = vmatpush3.msra.mxu0 %v2264_v0 }
 0xbc6   :  { %v2124_v57 = vmul.f32 %v2116_v3, %v2060_v5  ;;  %2774 = vmatprep.subr.mxu0 %v2263_v6 }
 0xbc7   :  { %2145 = vrot.lane.b32.xlu1 %v2123_v8, %s2914_s1  ;;  %2775 = vmatpush3.msra.mxu0 %v2263_v6 }
 0xbc8   :  { %2147 = vrot.lane.b32.xlu0 %v2124_v57, %s2914_s1  ;;  %2776 = vmatprep.subr.mxu0 %v2262_v2 }
 0xbc9   :  { %2777 = vmatpush3.msra.mxu0 %v2262_v2 }
 0xbcb   :  { %2167 = vperm.xlu1 %2831, %v2109_v18  }
 0xbcc   :  { %2172 = vperm.xlu0 %2832, %v2110_v47  }
 0xbcf   :  { %2182 = vperm.xlu1 %2831, %v2112_v41  }
 0xbd0   :  { %2177 = vperm.xlu0 %2832, %v2111_v52  }
 0xbd3   :  { %2187 = vperm.xlu1 %2831, %v2113_v56  }
 0xbd4   :  { %2192 = vperm.xlu0 %2832, %v2114_v22  }
 0xbd7   :  { %2202 = vperm.xlu1 %2831, %v2116_v3  }
 0xbd8   :  { %2833 = vset.pattern.permute.xlu0 %v2913_v27 }
 0xbdb   :  { %2835 = vset.pattern.permute.xlu1 %v2913_v27 }
 0xc25   :  { %v2134_v1 = vpop.permute.xlu0 %2133 }
 0xc26   :  { %v2157_v5 = vsub.f32 %v3574_v26, %v2134_v1  ;;  %v2261_v26 = vld [vmem:[%s3819_s9] sm:$0xff] }
 0xc27   :  { %2778 = vmatprep.subr.mxu0 %v2261_v26 }
 0xc28   :  { %2215 = vperm.xlu1 %2835, %v2157_v5   ;;  %2779 = vmatpush3.msra.mxu0 %v2261_v26 }
 0xc29   :  { %v2140_v51 = vpop.permute.xlu0 %2139 }
 0xc2a   :  { %v2160_v37 = vsub.f32 %v3586_v30, %v2140_v51 }
 0xc2b   :  { %v2136_v38 = vpop.permute.xlu1 %2135 }
 0xc2c   :  { %2230 = vperm.xlu1 %2835, %v2160_v37   ;;  %v2158_v11 = vsub.f32 %v3569_v25, %v2136_v38 }
 0xc2f   :  { %v2138_v12 = vpop.permute.xlu1 %2137 }
 0xc30   :  { %v2159_v63 = vsub.f32 %v3581_v28, %v2138_v12  ;;  %2220 = vperm.xlu1 %2835, %v2158_v11  }
 0xc32   :  { %2225 = vperm.xlu0 %2833, %v2159_v63  }
 0xc35   :  { %v2142_v15 = vpop.permute.xlu1 %2141 }
 0xc36   :  { %v2161_v30 = vsub.f32 %v3593_v31, %v2142_v15  ;;  %2834 = vset.pattern.permute.xlu0 %v2912_v10  ;;  %v2144_v17 = vpop.permute.xlu0 %2143 }
 0xc37   :  { %2197 = vperm.xlu0 %2834, %v2115_v9   ;;  %v2162_v60 = vsub.f32 %v3598_v32, %v2144_v17 }
 0xc38   :  { %2235 = vperm.xlu1 %2835, %v2161_v30  }
 0xc39   :  { %v2146_v24 = vpop.permute.xlu1 %2145 }
 0xc3a   :  { %v2163_v16 = vsub.f32 %v3605_v33, %v2146_v24  ;;  %v2148_v14 = vpop.permute.xlu0 %2147 }
 0xc3b   :  { %2836 = vset.pattern.permute.xlu0 %v2913_v27  ;;  %v2164_v25 = vsub.f32 %v3610_v34, %v2148_v14 }
 0xc3c   :  { %2240 = vperm.xlu1 %2835, %v2162_v60   ;;  %2245 = vperm.xlu0 %2836, %v2163_v16  }
 0xc40   :  { %2250 = vperm.xlu1 %2835, %v2164_v25  }
 0xc46   :  { %v2168_v28 = vpop.permute.xlu1 %2167 }
 0xc47   :  { %v2173_v10 = vpop.permute.xlu0 %2172  ;;  %v2205_v19 = vmul.f32 %v2168_v28, %v3648_v4 }
 0xc48   :  { %v2206_v27 = vmul.f32 %v2173_v10, %v3661_v39 }
 0xc4a   :  { %v2183_v31 = vpop.permute.xlu1 %2182 }
 0xc4b   :  { %v2178_v36 = vpop.permute.xlu0 %2177  ;;  %v2208_v46 = vmul.f32 %v2183_v31, %v3654_v7 }
 0xc4c   :  { %v2207_v42 = vmul.f32 %v2178_v36, %v3646_v59 }
 0xc4e   :  { %v2188_v18 = vpop.permute.xlu1 %2187 }
 0xc4f   :  { %v2193_v41 = vpop.permute.xlu0 %2192  ;;  %v2209_v47 = vmul.f32 %v2188_v18, %v3678_v55 }
 0xc50   :  { %v2210_v59 = vmul.f32 %v2193_v41, %v3682_v58 }
 0xc52   :  { %v2203_v13 = vpop.permute.xlu1 %2202 }
 0xc53   :  { %v2212_v62 = vmul.f32 %v2203_v13, %v3675_v20 }
 0xca3   :  { %v2216_v40 = vpop.permute.xlu1 %2215 }
 0xca4   :  { %v2253_v32 = vadd.f32 %v2216_v40, %v2205_v19 }
 0xca6   :  { %2780 = vmatprep.mubr.msk.f32.mxu0 %vm1996_vm6, %v2253_v32 }
 0xca7   :  { %v2231_v33 = vpop.permute.xlu1 %2230 }
 0xca8   :  { %v2256_v4 = vadd.f32 %v2231_v33, %v2208_v46 }
 0xcab   :  { %v2221_v34 = vpop.permute.xlu1 %2220 }
 0xcac   :  { %v2254_v43 = vadd.f32 %v2221_v34, %v2206_v27 }
 0xcad   :  { %v2226_v44 = vpop.permute.xlu0 %2225 }
 0xcae   :  { %v2255_v45 = vadd.f32 %v2226_v44, %v2207_v42  ;;  %2781 = vmatmul.mubr.msk.f32.vlgmr.msra.gmra.mxu0 %vm1996_vm6, %v2254_v43 }
 0xcb0   :  { %2783 = vmatprep.mubr.msk.f32.mxu0 %vm1996_vm6, %v2255_v45 }
 0xcb2   :  { %v2198_v49 = vpop.permute.xlu0 %2197  ;;  %2784 = vmatmul.mubr.msk.f32.gmra.mxu0 %vm1996_vm6, %v2256_v4 }
 0xcb3   :  { %v2236_v50 = vpop.permute.xlu1 %2235  ;;  %v2211_v52 = vmul.f32 %v2198_v49, %v3671_v48 }
 0xcb4   :  { %v2257_v39 = vadd.f32 %v2236_v50, %v2209_v47 }
 0xcb6   :  { %2786 = vmatprep.mubr.msk.f32.mxu0 %vm1996_vm6, %v2257_v39 }
 0xcb7   :  { %v2246_v29 = vpop.permute.xlu0 %2245  ;;  %v2241_v7 = vpop.permute.xlu1 %2240 }
 0xcb8   :  { %v2259_v54 = vadd.f32 %v2246_v29, %v2211_v52  ;;  %v2258_v56 = vadd.f32 %v2241_v7, %v2210_v59 }
 0xcba   :  { %2787 = vmatmul.mubr.msk.f32.gmra.mxu0 %vm1996_vm6, %v2258_v56 }
 0xcbb   :  { %2789 = vmatprep.mubr.msk.f32.mxu0 %vm1996_vm6, %v2259_v54  ;;  %v2251_v55 = vpop.permute.xlu1 %2250 }
 0xcbc   :  { %v2260_v21 = vadd.f32 %v2251_v55, %v2212_v62 }
 0xcbe   :  { %2790 = vmatmul.mubr.msk.f32.gmra.mxu0 %vm1996_vm6, %v2260_v21 }
 0xd6e   :  { %v2782_v58 = vpop.f32.mrf.mxu0 }
 0xd6f   :  { %2400 = vst.msk [vmem:[%s3820_s10 + $0x8] sm:$0xff] %vm2398_vm7, %v2782_v58 }
 0xd70   :  { %v2359_v48 = vpop.f32.mrf.mxu0 }
 0xd71   :  { %2399 = vst.msk [vmem:[%s3820_s10] sm:$0xff] %vm2398_vm7, %v2359_v48 }
 0xd72   :  { %v2785_v20 = vpop.f32.mrf.mxu0 }
 0xd73   :  { %2402 = vst.msk [vmem:[%s3820_s10 + $0x18] sm:$0xff] %vm2398_vm7, %v2785_v20 }
 0xd74   :  { %v2369_v22 = vpop.f32.mrf.mxu0 }
 0xd75   :  { %2401 = vst.msk [vmem:[%s3820_s10 + $0x10] sm:$0xff] %vm2398_vm7, %v2369_v22 }
 0xd7a   :  { %v2788_v53 = vpop.f32.mrf.mxu0 }
 0xd7b   :  { %2404 = vst.msk [vmem:[%s3820_s10 + $0x28] sm:$0xff] %vm2398_vm7, %v2788_v53 }
 0xd7c   :  { %v2379_v35 = vpop.f32.mrf.mxu0 }
 0xd7d   :  { %2403 = vst.msk [vmem:[%s3820_s10 + $0x20] sm:$0xff] %vm2398_vm7, %v2379_v35 }
 0xd7e   :  { %v2791_v9 = vpop.f32.mrf.mxu0 }
 0xd7f   :  { %2406 = vst.msk [vmem:[%s3820_s10 + $0x38] sm:$0xff] %vm2398_vm7, %v2791_v9 }
 0xd80   :  { %v2389_v23 = vpop.f32.mrf.mxu0 }
 0xd81   :  { %2405 = vst.msk [vmem:[%s3820_s10 + $0x30] sm:$0xff] %vm2398_vm7, %v2389_v23 }

</bundles_post_ra>
